<compile_context>
chip_gen: v7x
topology: tpu7x:2x2x1
jax: 0.10.0
libtpu: 0.0.40
codegen_flags: <defaults>
</compile_context>

<pallas_src>
import math

import jax
import jax.numpy as jnp
from jax import lax
from jax.experimental import pallas as pl
from jax.experimental.pallas import tpu as pltpu

# ---------------- model config (small, self-consistent) ----------------
BATCH = 2
SEQ = 8
HIDDEN = 32
NUM_HEADS = 4
HEAD_DIM = HIDDEN // NUM_HEADS
INTER = 4 * HIDDEN
LN_EPS = 1e-12
NEG_BIG = -1e9  # additive mask value blocking cross-batch attention in the fused (B*S) layout


def _layer_norm(x, gamma, beta):
    # Matches the PyTorch LayerNorm: biased variance, eps inside sqrt.  rsqrt -> EUP.
    u = jnp.mean(x, axis=-1, keepdims=True)
    d = x - u
    s = jnp.mean(d * d, axis=-1, keepdims=True)
    return gamma * (d * lax.rsqrt(s + LN_EPS)) + beta


def _gelu(x):
    # x * 0.5 * (1 + erf(x / sqrt(2)))
    return x * 0.5 * (1.0 + lax.erf(x / math.sqrt(2.0)))


def layer_kernel(
    x_ref,               # (B*S, H)        fused input hidden states
    mask_ref,            # (B*S, B*S)      additive score mask (BERT mask + cross-batch block)
    wq_ref, bq_ref,      # (NH, H, DH), (NH, 1, DH)   -- 1/sqrt(DH) already folded in
    wk_ref, bk_ref,      # (NH, H, DH), (NH, 1, DH)
    wv_ref, bv_ref,      # (NH, H, DH), (NH, 1, DH)
    wo_ref, bo_ref,      # (NH, DH, H), (1, H)
    g1_ref, be1_ref,     # (1, H), (1, H)   attention LayerNorm
    w1_ref, b1_ref,      # (H, 4H), (1, 4H) intermediate dense_1
    w2_ref, b2_ref,      # (4H, H), (1, H)  intermediate dense_2
    g2_ref, be2_ref,     # (1, H), (1, H)   intermediate LayerNorm
    out_ref,             # (B*S, H)
):
    x = x_ref[...]            # (BS, H) f32
    mask = mask_ref[...]      # (BS, BS) additive

    # ----- multi-head attention: static unrolled loop over heads.
    # Only leading-axis ref indexing (wq_ref[h], ...) -> no lane slices, no transposes,
    # no concatenate.  The head-concat + output dense is computed as sum_h ctx_h @ Wo_h.
    attn = None
    for h in range(NUM_HEADS):
        q = jnp.dot(x, wq_ref[h], preferred_element_type=jnp.float32) + bq_ref[h]  # (BS, DH), scaled
        k = jnp.dot(x, wk_ref[h], preferred_element_type=jnp.float32) + bk_ref[h]  # (BS, DH)
        v = jnp.dot(x, wv_ref[h], preferred_element_type=jnp.float32) + bv_ref[h]  # (BS, DH)

        # scores = q @ k^T via dot_general contracting the last axes (no explicit transpose)
        scores = lax.dot_general(
            q, k, (((1,), (1,)), ((), ())), preferred_element_type=jnp.float32
        ) + mask                                                                    # (BS, BS)

        m = jnp.max(scores, axis=-1, keepdims=True)
        e = jnp.exp(scores - m)
        inv_denom = pl.reciprocal(jnp.sum(e, axis=-1, keepdims=True), approx=True)  # EUP
        probs = e * inv_denom
        # attn_dropout is identity in eval mode

        ctx = jnp.dot(probs, v, preferred_element_type=jnp.float32)                 # (BS, DH)
        part = jnp.dot(ctx, wo_ref[h], preferred_element_type=jnp.float32)          # (BS, H)
        attn = part if attn is None else attn + part

    attn = attn + bo_ref[...]
    # out_dropout is identity in eval mode
    h1 = _layer_norm(attn + x, g1_ref[...], be1_ref[...])                            # (BS, H)

    # ----- feed-forward: dense_1 -> gelu -> dense_2 + residual + LayerNorm -----
    inter = jnp.dot(h1, w1_ref[...], preferred_element_type=jnp.float32) + b1_ref[...]
    inter = _gelu(inter)
    ffn = jnp.dot(inter, w2_ref[...], preferred_element_type=jnp.float32) + b2_ref[...]
    # dropout is identity in eval mode
    out_ref[...] = _layer_norm(ffn + h1, g2_ref[...], be2_ref[...]).astype(out_ref.dtype)


@jax.jit
def layer_forward(hidden_states, attention_mask, params):
    """hidden_states: (B, S, H); attention_mask: (B, 1, 1, S) additive mask."""
    B, S, H = hidden_states.shape
    NH, DH = NUM_HEADS, HEAD_DIM

    # Fold batch into the matmul M dimension.
    x2d = hidden_states.reshape(B * S, H)

    # (B*S, B*S) additive score mask: within-batch -> BERT additive key mask (broadcast over
    # query rows / heads), cross-batch -> NEG_BIG so softmax over the fused key axis is exactly
    # the per-batch softmax (cross-batch exp underflows to 0 in f32).
    mask_keys = attention_mask.reshape(B, S).astype(jnp.float32)                  # (B, S)
    same = jnp.arange(B)[:, None] == jnp.arange(B)[None, :]                        # (B, B)
    blk = jnp.where(same[:, :, None], mask_keys[None, :, :], jnp.float32(NEG_BIG))  # (B, B, S)
    mask_full = jnp.broadcast_to(blk[:, None, :, :], (B, S, B, S)).reshape(B * S, B * S)

    # Per-head weight slabs prepared OUTSIDE the kernel (plain XLA ops on tiny weights).
    scale = 1.0 / math.sqrt(DH)

    def heads_in(w):          # (H, H) (in,out) -> (NH, H, DH)
        return w.reshape(H, NH, DH).transpose(1, 0, 2)

    def heads_bias(b):        # (1, H) -> (NH, 1, DH)
        return b.reshape(NH, DH)[:, None, :]

    wq_h = heads_in(params["wq"] * scale)   # fold 1/sqrt(DH) into the query projection
    bq_h = heads_bias(params["bq"] * scale)
    wk_h = heads_in(params["wk"])
    bk_h = heads_bias(params["bk"])
    wv_h = heads_in(params["wv"])
    bv_h = heads_bias(params["bv"])
    wo_h = params["wo"].reshape(NH, DH, H)  # rows of Wo grouped per head

    vmem = pl.BlockSpec(memory_space=pltpu.MemorySpace.VMEM)  # whole array resident in VMEM
    n_inputs = 18

    out2d = pl.pallas_call(
        layer_kernel,
        out_shape=jax.ShapeDtypeStruct((B * S, H), hidden_states.dtype),
        in_specs=[vmem] * n_inputs,
        out_specs=vmem,
    )(
        x2d, mask_full,
        wq_h, bq_h, wk_h, bk_h, wv_h, bv_h, wo_h, params["bo"],
        params["ln1_g"], params["ln1_b"],
        params["w1"], params["b1"],
        params["w2"], params["b2"],
        params["ln2_g"], params["ln2_b"],
    )
    return out2d.reshape(B, S, H)


def layer_reference(hidden_states, attention_mask, params):
    """Pure-JAX mirror of the PyTorch module (for a correctness check)."""
    B, S, H = hidden_states.shape
    NH, DH = NUM_HEADS, HEAD_DIM
    x = hidden_states

    def dense(t, w, b):
        return jnp.einsum("bsi,io->bso", t, w) + b

    def split_heads(t):
        return t.reshape(B, S, NH, DH).transpose(0, 2, 1, 3)

    q = split_heads(dense(x, params["wq"], params["bq"]))
    k = split_heads(dense(x, params["wk"], params["bk"]))
    v = split_heads(dense(x, params["wv"], params["bv"]))
    scores = jnp.einsum("bhqd,bhkd->bhqk", q, k) / math.sqrt(DH)
    scores = scores + attention_mask                      # (B,1,1,S) broadcasts
    probs = jax.nn.softmax(scores, axis=-1)
    ctx = jnp.einsum("bhqk,bhkd->bhqd", probs, v).transpose(0, 2, 1, 3).reshape(B, S, H)
    attn = dense(ctx, params["wo"], params["bo"])

    def ln(t, g, b):
        u = t.mean(-1, keepdims=True)
        s = ((t - u) ** 2).mean(-1, keepdims=True)
        return g * (t - u) / jnp.sqrt(s + LN_EPS) + b

    h1 = ln(attn + x, params["ln1_g"], params["ln1_b"])
    inter = _gelu(dense(h1, params["w1"], params["b1"]))
    ffn = dense(inter, params["w2"], params["b2"])
    return ln(ffn + h1, params["ln2_g"], params["ln2_b"])


def init_params(key):
    """Deterministic synthetic parameters (shapes match the PyTorch module)."""
    keys = jax.random.split(key, 12)
    std = 0.02

    def w(k, shape):
        return (std * jax.random.normal(k, shape)).astype(jnp.float32)

    H, I = HIDDEN, INTER
    return {
        # weights stored as (in_features, out_features)
        "wq": w(keys[0], (H, H)), "bq": w(keys[1], (1, H)),
        "wk": w(keys[2], (H, H)), "bk": w(keys[3], (1, H)),
        "wv": w(keys[4], (H, H)), "bv": w(keys[5], (1, H)),
        "wo": w(keys[6], (H, H)), "bo": w(keys[7], (1, H)),
        "ln1_g": jnp.ones((1, H), jnp.float32), "ln1_b": jnp.zeros((1, H), jnp.float32),
        "w1": w(keys[8], (H, I)), "b1": w(keys[9], (1, I)),
        "w2": w(keys[10], (I, H)), "b2": w(keys[11], (1, H)),
        "ln2_g": jnp.ones((1, H), jnp.float32), "ln2_b": jnp.zeros((1, H), jnp.float32),
    }


if __name__ == "__main__":
    key = jax.random.PRNGKey(0)
    k_x, k_p = jax.random.split(key)

    hidden_states = jax.random.normal(k_x, (BATCH, SEQ, HIDDEN), dtype=jnp.float32)
    # additive attention mask (0 = attend, -10000 = masked), BERT-style shape (B,1,1,S)
    attention_mask = jnp.zeros((BATCH, 1, 1, SEQ), dtype=jnp.float32)
    attention_mask = attention_mask.at[:, :, :, -2:].set(-10000.0)

    params = init_params(k_p)

    out = layer_forward(hidden_states, attention_mask, params)
    jax.block_until_ready(out)

    ref = layer_reference(hidden_states, attention_mask, params)
    assert out.shape == (BATCH, SEQ, HIDDEN)
    assert bool(jnp.all(jnp.isfinite(out)))
    assert bool(jnp.allclose(out, ref, atol=3e-2, rtol=3e-2)), float(jnp.max(jnp.abs(out - ref)))
    print("KERNEL_OK")
</pallas_src>

<mosaic_0001>
module attributes {stable_mosaic.version = 11 : i64} {
  func.func @layer_kernel(%arg0: memref<16x32xf32, #tpu.memory_space<vmem>>, %arg1: memref<16x16xf32, #tpu.memory_space<vmem>>, %arg2: memref<4x32x8xf32, #tpu.memory_space<vmem>>, %arg3: memref<4x1x8xf32, #tpu.memory_space<vmem>>, %arg4: memref<4x32x8xf32, #tpu.memory_space<vmem>>, %arg5: memref<4x1x8xf32, #tpu.memory_space<vmem>>, %arg6: memref<4x32x8xf32, #tpu.memory_space<vmem>>, %arg7: memref<4x1x8xf32, #tpu.memory_space<vmem>>, %arg8: memref<4x8x32xf32, #tpu.memory_space<vmem>>, %arg9: memref<1x32xf32, #tpu.memory_space<vmem>>, %arg10: memref<1x32xf32, #tpu.memory_space<vmem>>, %arg11: memref<1x32xf32, #tpu.memory_space<vmem>>, %arg12: memref<32x128xf32, #tpu.memory_space<vmem>>, %arg13: memref<1x128xf32, #tpu.memory_space<vmem>>, %arg14: memref<128x32xf32, #tpu.memory_space<vmem>>, %arg15: memref<1x32xf32, #tpu.memory_space<vmem>>, %arg16: memref<1x32xf32, #tpu.memory_space<vmem>>, %arg17: memref<1x32xf32, #tpu.memory_space<vmem>>, %arg18: memref<16x32xf32, #tpu.memory_space<vmem>>) attributes {dimension_semantics = [], scalar_prefetch = 0 : i64, scratch_operands = 0 : i64, tpu.core_type = #tpu.core_type<tc>} {
    %c0 = arith.constant 0 : index
    %c0_0 = arith.constant 0 : index
    %0 = vector.load %arg0[%c0, %c0_0] : memref<16x32xf32, #tpu.memory_space<vmem>>, vector<16x32xf32>
    %c0_1 = arith.constant 0 : index
    %c0_2 = arith.constant 0 : index
    %1 = vector.load %arg1[%c0_1, %c0_2] : memref<16x16xf32, #tpu.memory_space<vmem>>, vector<16x16xf32>
    %c0_3 = arith.constant 0 : index
    %c0_4 = arith.constant 0 : index
    %c0_5 = arith.constant 0 : index
    %2 = vector.load %arg2[%c0_3, %c0_4, %c0_5] : memref<4x32x8xf32, #tpu.memory_space<vmem>>, vector<1x32x8xf32>
    %3 = vector.shape_cast %2 : vector<1x32x8xf32> to vector<32x8xf32>
    %cst = arith.constant dense<0.000000e+00> : vector<16x8xf32>
    %4 = tpu.matmul %0, %3, %cst {dimension_numbers = #tpu.dot_dimension_numbers<[1], [0], [0], [1], [0, 0, 1, 1], [], []>} : vector<16x32xf32>, vector<32x8xf32>, vector<16x8xf32> -> vector<16x8xf32>
    %c0_6 = arith.constant 0 : index
    %c0_7 = arith.constant 0 : index
    %c0_8 = arith.constant 0 : index
    %5 = vector.load %arg3[%c0_6, %c0_7, %c0_8] : memref<4x1x8xf32, #tpu.memory_space<vmem>>, vector<1x1x8xf32>
    %6 = vector.shape_cast %5 : vector<1x1x8xf32> to vector<1x8xf32>
    %7 = vector.broadcast %6 : vector<1x8xf32> to vector<16x8xf32>
    %8 = arith.addf %4, %7 : vector<16x8xf32>
    %c0_9 = arith.constant 0 : index
    %c0_10 = arith.constant 0 : index
    %c0_11 = arith.constant 0 : index
    %9 = vector.load %arg4[%c0_9, %c0_10, %c0_11] : memref<4x32x8xf32, #tpu.memory_space<vmem>>, vector<1x32x8xf32>
    %10 = vector.shape_cast %9 : vector<1x32x8xf32> to vector<32x8xf32>
    %cst_12 = arith.constant dense<0.000000e+00> : vector<16x8xf32>
    %11 = tpu.matmul %0, %10, %cst_12 {dimension_numbers = #tpu.dot_dimension_numbers<[1], [0], [0], [1], [0, 0, 1, 1], [], []>} : vector<16x32xf32>, vector<32x8xf32>, vector<16x8xf32> -> vector<16x8xf32>
    %c0_13 = arith.constant 0 : index
    %c0_14 = arith.constant 0 : index
    %c0_15 = arith.constant 0 : index
    %12 = vector.load %arg5[%c0_13, %c0_14, %c0_15] : memref<4x1x8xf32, #tpu.memory_space<vmem>>, vector<1x1x8xf32>
    %13 = vector.shape_cast %12 : vector<1x1x8xf32> to vector<1x8xf32>
    %14 = vector.broadcast %13 : vector<1x8xf32> to vector<16x8xf32>
    %15 = arith.addf %11, %14 : vector<16x8xf32>
    %c0_16 = arith.constant 0 : index
    %c0_17 = arith.constant 0 : index
    %c0_18 = arith.constant 0 : index
    %16 = vector.load %arg6[%c0_16, %c0_17, %c0_18] : memref<4x32x8xf32, #tpu.memory_space<vmem>>, vector<1x32x8xf32>
    %17 = vector.shape_cast %16 : vector<1x32x8xf32> to vector<32x8xf32>
    %cst_19 = arith.constant dense<0.000000e+00> : vector<16x8xf32>
    %18 = tpu.matmul %0, %17, %cst_19 {dimension_numbers = #tpu.dot_dimension_numbers<[1], [0], [0], [1], [0, 0, 1, 1], [], []>} : vector<16x32xf32>, vector<32x8xf32>, vector<16x8xf32> -> vector<16x8xf32>
    %c0_20 = arith.constant 0 : index
    %c0_21 = arith.constant 0 : index
    %c0_22 = arith.constant 0 : index
    %19 = vector.load %arg7[%c0_20, %c0_21, %c0_22] : memref<4x1x8xf32, #tpu.memory_space<vmem>>, vector<1x1x8xf32>
    %20 = vector.shape_cast %19 : vector<1x1x8xf32> to vector<1x8xf32>
    %21 = vector.broadcast %20 : vector<1x8xf32> to vector<16x8xf32>
    %22 = arith.addf %18, %21 : vector<16x8xf32>
    %cst_23 = arith.constant dense<0.000000e+00> : vector<16x16xf32>
    %23 = tpu.matmul %8, %15, %cst_23 {dimension_numbers = #tpu.dot_dimension_numbers<[1], [1], [0], [0], [0, 0, 1, 0], [], []>} : vector<16x8xf32>, vector<16x8xf32>, vector<16x16xf32> -> vector<16x16xf32>
    %24 = arith.addf %23, %1 : vector<16x16xf32>
    %cst_24 = arith.constant dense<0xFF800000> : vector<16xf32>
    %25 = vector.multi_reduction <maximumf>, %24, %cst_24 [1] : vector<16x16xf32> to vector<16xf32>
    %26 = vector.shape_cast %25 : vector<16xf32> to vector<16x1xf32>
    %27 = vector.broadcast %26 : vector<16x1xf32> to vector<16x16xf32>
    %28 = arith.subf %24, %27 : vector<16x16xf32>
    %29 = math.exp %28 : vector<16x16xf32>
    %cst_25 = arith.constant dense<0.000000e+00> : vector<16xf32>
    %30 = vector.multi_reduction <add>, %29, %cst_25 [1] : vector<16x16xf32> to vector<16xf32>
    %31 = vector.shape_cast %30 : vector<16xf32> to vector<16x1xf32>
    %32 = tpu.reciprocal %31 {approx = true} : vector<16x1xf32> -> vector<16x1xf32>
    %33 = vector.broadcast %32 : vector<16x1xf32> to vector<16x16xf32>
    %34 = arith.mulf %29, %33 : vector<16x16xf32>
    %cst_26 = arith.constant dense<0.000000e+00> : vector<16x8xf32>
    %35 = tpu.matmul %34, %22, %cst_26 {dimension_numbers = #tpu.dot_dimension_numbers<[1], [0], [0], [1], [0, 0, 1, 1], [], []>} : vector<16x16xf32>, vector<16x8xf32>, vector<16x8xf32> -> vector<16x8xf32>
    %c0_27 = arith.constant 0 : index
    %c0_28 = arith.constant 0 : index
    %c0_29 = arith.constant 0 : index
    %36 = vector.load %arg8[%c0_27, %c0_28, %c0_29] : memref<4x8x32xf32, #tpu.memory_space<vmem>>, vector<1x8x32xf32>
    %37 = vector.shape_cast %36 : vector<1x8x32xf32> to vector<8x32xf32>
    %cst_30 = arith.constant dense<0.000000e+00> : vector<16x32xf32>
    %38 = tpu.matmul %35, %37, %cst_30 {dimension_numbers = #tpu.dot_dimension_numbers<[1], [0], [0], [1], [0, 0, 1, 1], [], []>} : vector<16x8xf32>, vector<8x32xf32>, vector<16x32xf32> -> vector<16x32xf32>
    %c1 = arith.constant 1 : index
    %c0_31 = arith.constant 0 : index
    %c0_32 = arith.constant 0 : index
    %39 = vector.load %arg2[%c1, %c0_31, %c0_32] : memref<4x32x8xf32, #tpu.memory_space<vmem>>, vector<1x32x8xf32>
    %40 = vector.shape_cast %39 : vector<1x32x8xf32> to vector<32x8xf32>
    %cst_33 = arith.constant dense<0.000000e+00> : vector<16x8xf32>
    %41 = tpu.matmul %0, %40, %cst_33 {dimension_numbers = #tpu.dot_dimension_numbers<[1], [0], [0], [1], [0, 0, 1, 1], [], []>} : vector<16x32xf32>, vector<32x8xf32>, vector<16x8xf32> -> vector<16x8xf32>
    %c1_34 = arith.constant 1 : index
    %c0_35 = arith.constant 0 : index
    %c0_36 = arith.constant 0 : index
    %42 = vector.load %arg3[%c1_34, %c0_35, %c0_36] : memref<4x1x8xf32, #tpu.memory_space<vmem>>, vector<1x1x8xf32>
    %43 = vector.shape_cast %42 : vector<1x1x8xf32> to vector<1x8xf32>
    %44 = vector.broadcast %43 : vector<1x8xf32> to vector<16x8xf32>
    %45 = arith.addf %41, %44 : vector<16x8xf32>
    %c1_37 = arith.constant 1 : index
    %c0_38 = arith.constant 0 : index
    %c0_39 = arith.constant 0 : index
    %46 = vector.load %arg4[%c1_37, %c0_38, %c0_39] : memref<4x32x8xf32, #tpu.memory_space<vmem>>, vector<1x32x8xf32>
    %47 = vector.shape_cast %46 : vector<1x32x8xf32> to vector<32x8xf32>
    %cst_40 = arith.constant dense<0.000000e+00> : vector<16x8xf32>
    %48 = tpu.matmul %0, %47, %cst_40 {dimension_numbers = #tpu.dot_dimension_numbers<[1], [0], [0], [1], [0, 0, 1, 1], [], []>} : vector<16x32xf32>, vector<32x8xf32>, vector<16x8xf32> -> vector<16x8xf32>
    %c1_41 = arith.constant 1 : index
    %c0_42 = arith.constant 0 : index
    %c0_43 = arith.constant 0 : index
    %49 = vector.load %arg5[%c1_41, %c0_42, %c0_43] : memref<4x1x8xf32, #tpu.memory_space<vmem>>, vector<1x1x8xf32>
    %50 = vector.shape_cast %49 : vector<1x1x8xf32> to vector<1x8xf32>
    %51 = vector.broadcast %50 : vector<1x8xf32> to vector<16x8xf32>
    %52 = arith.addf %48, %51 : vector<16x8xf32>
    %c1_44 = arith.constant 1 : index
    %c0_45 = arith.constant 0 : index
    %c0_46 = arith.constant 0 : index
    %53 = vector.load %arg6[%c1_44, %c0_45, %c0_46] : memref<4x32x8xf32, #tpu.memory_space<vmem>>, vector<1x32x8xf32>
    %54 = vector.shape_cast %53 : vector<1x32x8xf32> to vector<32x8xf32>
    %cst_47 = arith.constant dense<0.000000e+00> : vector<16x8xf32>
    %55 = tpu.matmul %0, %54, %cst_47 {dimension_numbers = #tpu.dot_dimension_numbers<[1], [0], [0], [1], [0, 0, 1, 1], [], []>} : vector<16x32xf32>, vector<32x8xf32>, vector<16x8xf32> -> vector<16x8xf32>
    %c1_48 = arith.constant 1 : index
    %c0_49 = arith.constant 0 : index
    %c0_50 = arith.constant 0 : index
    %56 = vector.load %arg7[%c1_48, %c0_49, %c0_50] : memref<4x1x8xf32, #tpu.memory_space<vmem>>, vector<1x1x8xf32>
    %57 = vector.shape_cast %56 : vector<1x1x8xf32> to vector<1x8xf32>
    %58 = vector.broadcast %57 : vector<1x8xf32> to vector<16x8xf32>
    %59 = arith.addf %55, %58 : vector<16x8xf32>
    %cst_51 = arith.constant dense<0.000000e+00> : vector<16x16xf32>
    %60 = tpu.matmul %45, %52, %cst_51 {dimension_numbers = #tpu.dot_dimension_numbers<[1], [1], [0], [0], [0, 0, 1, 0], [], []>} : vector<16x8xf32>, vector<16x8xf32>, vector<16x16xf32> -> vector<16x16xf32>
    %61 = arith.addf %60, %1 : vector<16x16xf32>
    %cst_52 = arith.constant dense<0xFF800000> : vector<16xf32>
    %62 = vector.multi_reduction <maximumf>, %61, %cst_52 [1] : vector<16x16xf32> to vector<16xf32>
    %63 = vector.shape_cast %62 : vector<16xf32> to vector<16x1xf32>
    %64 = vector.broadcast %63 : vector<16x1xf32> to vector<16x16xf32>
    %65 = arith.subf %61, %64 : vector<16x16xf32>
    %66 = math.exp %65 : vector<16x16xf32>
    %cst_53 = arith.constant dense<0.000000e+00> : vector<16xf32>
    %67 = vector.multi_reduction <add>, %66, %cst_53 [1] : vector<16x16xf32> to vector<16xf32>
    %68 = vector.shape_cast %67 : vector<16xf32> to vector<16x1xf32>
    %69 = tpu.reciprocal %68 {approx = true} : vector<16x1xf32> -> vector<16x1xf32>
    %70 = vector.broadcast %69 : vector<16x1xf32> to vector<16x16xf32>
    %71 = arith.mulf %66, %70 : vector<16x16xf32>
    %cst_54 = arith.constant dense<0.000000e+00> : vector<16x8xf32>
    %72 = tpu.matmul %71, %59, %cst_54 {dimension_numbers = #tpu.dot_dimension_numbers<[1], [0], [0], [1], [0, 0, 1, 1], [], []>} : vector<16x16xf32>, vector<16x8xf32>, vector<16x8xf32> -> vector<16x8xf32>
    %c1_55 = arith.constant 1 : index
    %c0_56 = arith.constant 0 : index
    %c0_57 = arith.constant 0 : index
    %73 = vector.load %arg8[%c1_55, %c0_56, %c0_57] : memref<4x8x32xf32, #tpu.memory_space<vmem>>, vector<1x8x32xf32>
    %74 = vector.shape_cast %73 : vector<1x8x32xf32> to vector<8x32xf32>
    %cst_58 = arith.constant dense<0.000000e+00> : vector<16x32xf32>
    %75 = tpu.matmul %72, %74, %cst_58 {dimension_numbers = #tpu.dot_dimension_numbers<[1], [0], [0], [1], [0, 0, 1, 1], [], []>} : vector<16x8xf32>, vector<8x32xf32>, vector<16x32xf32> -> vector<16x32xf32>
    %76 = arith.addf %38, %75 : vector<16x32xf32>
    %c2 = arith.constant 2 : index
    %c0_59 = arith.constant 0 : index
    %c0_60 = arith.constant 0 : index
    %77 = vector.load %arg2[%c2, %c0_59, %c0_60] : memref<4x32x8xf32, #tpu.memory_space<vmem>>, vector<1x32x8xf32>
    %78 = vector.shape_cast %77 : vector<1x32x8xf32> to vector<32x8xf32>
    %cst_61 = arith.constant dense<0.000000e+00> : vector<16x8xf32>
    %79 = tpu.matmul %0, %78, %cst_61 {dimension_numbers = #tpu.dot_dimension_numbers<[1], [0], [0], [1], [0, 0, 1, 1], [], []>} : vector<16x32xf32>, vector<32x8xf32>, vector<16x8xf32> -> vector<16x8xf32>
    %c2_62 = arith.constant 2 : index
    %c0_63 = arith.constant 0 : index
    %c0_64 = arith.constant 0 : index
    %80 = vector.load %arg3[%c2_62, %c0_63, %c0_64] : memref<4x1x8xf32, #tpu.memory_space<vmem>>, vector<1x1x8xf32>
    %81 = vector.shape_cast %80 : vector<1x1x8xf32> to vector<1x8xf32>
    %82 = vector.broadcast %81 : vector<1x8xf32> to vector<16x8xf32>
    %83 = arith.addf %79, %82 : vector<16x8xf32>
    %c2_65 = arith.constant 2 : index
    %c0_66 = arith.constant 0 : index
    %c0_67 = arith.constant 0 : index
    %84 = vector.load %arg4[%c2_65, %c0_66, %c0_67] : memref<4x32x8xf32, #tpu.memory_space<vmem>>, vector<1x32x8xf32>
    %85 = vector.shape_cast %84 : vector<1x32x8xf32> to vector<32x8xf32>
    %cst_68 = arith.constant dense<0.000000e+00> : vector<16x8xf32>
    %86 = tpu.matmul %0, %85, %cst_68 {dimension_numbers = #tpu.dot_dimension_numbers<[1], [0], [0], [1], [0, 0, 1, 1], [], []>} : vector<16x32xf32>, vector<32x8xf32>, vector<16x8xf32> -> vector<16x8xf32>
    %c2_69 = arith.constant 2 : index
    %c0_70 = arith.constant 0 : index
    %c0_71 = arith.constant 0 : index
    %87 = vector.load %arg5[%c2_69, %c0_70, %c0_71] : memref<4x1x8xf32, #tpu.memory_space<vmem>>, vector<1x1x8xf32>
    %88 = vector.shape_cast %87 : vector<1x1x8xf32> to vector<1x8xf32>
    %89 = vector.broadcast %88 : vector<1x8xf32> to vector<16x8xf32>
    %90 = arith.addf %86, %89 : vector<16x8xf32>
    %c2_72 = arith.constant 2 : index
    %c0_73 = arith.constant 0 : index
    %c0_74 = arith.constant 0 : index
    %91 = vector.load %arg6[%c2_72, %c0_73, %c0_74] : memref<4x32x8xf32, #tpu.memory_space<vmem>>, vector<1x32x8xf32>
    %92 = vector.shape_cast %91 : vector<1x32x8xf32> to vector<32x8xf32>
    %cst_75 = arith.constant dense<0.000000e+00> : vector<16x8xf32>
    %93 = tpu.matmul %0, %92, %cst_75 {dimension_numbers = #tpu.dot_dimension_numbers<[1], [0], [0], [1], [0, 0, 1, 1], [], []>} : vector<16x32xf32>, vector<32x8xf32>, vector<16x8xf32> -> vector<16x8xf32>
    %c2_76 = arith.constant 2 : index
    %c0_77 = arith.constant 0 : index
    %c0_78 = arith.constant 0 : index
    %94 = vector.load %arg7[%c2_76, %c0_77, %c0_78] : memref<4x1x8xf32, #tpu.memory_space<vmem>>, vector<1x1x8xf32>
    %95 = vector.shape_cast %94 : vector<1x1x8xf32> to vector<1x8xf32>
    %96 = vector.broadcast %95 : vector<1x8xf32> to vector<16x8xf32>
    %97 = arith.addf %93, %96 : vector<16x8xf32>
    %cst_79 = arith.constant dense<0.000000e+00> : vector<16x16xf32>
    %98 = tpu.matmul %83, %90, %cst_79 {dimension_numbers = #tpu.dot_dimension_numbers<[1], [1], [0], [0], [0, 0, 1, 0], [], []>} : vector<16x8xf32>, vector<16x8xf32>, vector<16x16xf32> -> vector<16x16xf32>
    %99 = arith.addf %98, %1 : vector<16x16xf32>
    %cst_80 = arith.constant dense<0xFF800000> : vector<16xf32>
    %100 = vector.multi_reduction <maximumf>, %99, %cst_80 [1] : vector<16x16xf32> to vector<16xf32>
    %101 = vector.shape_cast %100 : vector<16xf32> to vector<16x1xf32>
    %102 = vector.broadcast %101 : vector<16x1xf32> to vector<16x16xf32>
    %103 = arith.subf %99, %102 : vector<16x16xf32>
    %104 = math.exp %103 : vector<16x16xf32>
    %cst_81 = arith.constant dense<0.000000e+00> : vector<16xf32>
    %105 = vector.multi_reduction <add>, %104, %cst_81 [1] : vector<16x16xf32> to vector<16xf32>
    %106 = vector.shape_cast %105 : vector<16xf32> to vector<16x1xf32>
    %107 = tpu.reciprocal %106 {approx = true} : vector<16x1xf32> -> vector<16x1xf32>
    %108 = vector.broadcast %107 : vector<16x1xf32> to vector<16x16xf32>
    %109 = arith.mulf %104, %108 : vector<16x16xf32>
    %cst_82 = arith.constant dense<0.000000e+00> : vector<16x8xf32>
    %110 = tpu.matmul %109, %97, %cst_82 {dimension_numbers = #tpu.dot_dimension_numbers<[1], [0], [0], [1], [0, 0, 1, 1], [], []>} : vector<16x16xf32>, vector<16x8xf32>, vector<16x8xf32> -> vector<16x8xf32>
    %c2_83 = arith.constant 2 : index
    %c0_84 = arith.constant 0 : index
    %c0_85 = arith.constant 0 : index
    %111 = vector.load %arg8[%c2_83, %c0_84, %c0_85] : memref<4x8x32xf32, #tpu.memory_space<vmem>>, vector<1x8x32xf32>
    %112 = vector.shape_cast %111 : vector<1x8x32xf32> to vector<8x32xf32>
    %cst_86 = arith.constant dense<0.000000e+00> : vector<16x32xf32>
    %113 = tpu.matmul %110, %112, %cst_86 {dimension_numbers = #tpu.dot_dimension_numbers<[1], [0], [0], [1], [0, 0, 1, 1], [], []>} : vector<16x8xf32>, vector<8x32xf32>, vector<16x32xf32> -> vector<16x32xf32>
    %114 = arith.addf %76, %113 : vector<16x32xf32>
    %c3 = arith.constant 3 : index
    %c0_87 = arith.constant 0 : index
    %c0_88 = arith.constant 0 : index
    %115 = vector.load %arg2[%c3, %c0_87, %c0_88] : memref<4x32x8xf32, #tpu.memory_space<vmem>>, vector<1x32x8xf32>
    %116 = vector.shape_cast %115 : vector<1x32x8xf32> to vector<32x8xf32>
    %cst_89 = arith.constant dense<0.000000e+00> : vector<16x8xf32>
    %117 = tpu.matmul %0, %116, %cst_89 {dimension_numbers = #tpu.dot_dimension_numbers<[1], [0], [0], [1], [0, 0, 1, 1], [], []>} : vector<16x32xf32>, vector<32x8xf32>, vector<16x8xf32> -> vector<16x8xf32>
    %c3_90 = arith.constant 3 : index
    %c0_91 = arith.constant 0 : index
    %c0_92 = arith.constant 0 : index
    %118 = vector.load %arg3[%c3_90, %c0_91, %c0_92] : memref<4x1x8xf32, #tpu.memory_space<vmem>>, vector<1x1x8xf32>
    %119 = vector.shape_cast %118 : vector<1x1x8xf32> to vector<1x8xf32>
    %120 = vector.broadcast %119 : vector<1x8xf32> to vector<16x8xf32>
    %121 = arith.addf %117, %120 : vector<16x8xf32>
    %c3_93 = arith.constant 3 : index
    %c0_94 = arith.constant 0 : index
    %c0_95 = arith.constant 0 : index
    %122 = vector.load %arg4[%c3_93, %c0_94, %c0_95] : memref<4x32x8xf32, #tpu.memory_space<vmem>>, vector<1x32x8xf32>
    %123 = vector.shape_cast %122 : vector<1x32x8xf32> to vector<32x8xf32>
    %cst_96 = arith.constant dense<0.000000e+00> : vector<16x8xf32>
    %124 = tpu.matmul %0, %123, %cst_96 {dimension_numbers = #tpu.dot_dimension_numbers<[1], [0], [0], [1], [0, 0, 1, 1], [], []>} : vector<16x32xf32>, vector<32x8xf32>, vector<16x8xf32> -> vector<16x8xf32>
    %c3_97 = arith.constant 3 : index
    %c0_98 = arith.constant 0 : index
    %c0_99 = arith.constant 0 : index
    %125 = vector.load %arg5[%c3_97, %c0_98, %c0_99] : memref<4x1x8xf32, #tpu.memory_space<vmem>>, vector<1x1x8xf32>
    %126 = vector.shape_cast %125 : vector<1x1x8xf32> to vector<1x8xf32>
    %127 = vector.broadcast %126 : vector<1x8xf32> to vector<16x8xf32>
    %128 = arith.addf %124, %127 : vector<16x8xf32>
    %c3_100 = arith.constant 3 : index
    %c0_101 = arith.constant 0 : index
    %c0_102 = arith.constant 0 : index
    %129 = vector.load %arg6[%c3_100, %c0_101, %c0_102] : memref<4x32x8xf32, #tpu.memory_space<vmem>>, vector<1x32x8xf32>
    %130 = vector.shape_cast %129 : vector<1x32x8xf32> to vector<32x8xf32>
    %cst_103 = arith.constant dense<0.000000e+00> : vector<16x8xf32>
    %131 = tpu.matmul %0, %130, %cst_103 {dimension_numbers = #tpu.dot_dimension_numbers<[1], [0], [0], [1], [0, 0, 1, 1], [], []>} : vector<16x32xf32>, vector<32x8xf32>, vector<16x8xf32> -> vector<16x8xf32>
    %c3_104 = arith.constant 3 : index
    %c0_105 = arith.constant 0 : index
    %c0_106 = arith.constant 0 : index
    %132 = vector.load %arg7[%c3_104, %c0_105, %c0_106] : memref<4x1x8xf32, #tpu.memory_space<vmem>>, vector<1x1x8xf32>
    %133 = vector.shape_cast %132 : vector<1x1x8xf32> to vector<1x8xf32>
    %134 = vector.broadcast %133 : vector<1x8xf32> to vector<16x8xf32>
    %135 = arith.addf %131, %134 : vector<16x8xf32>
    %cst_107 = arith.constant dense<0.000000e+00> : vector<16x16xf32>
    %136 = tpu.matmul %121, %128, %cst_107 {dimension_numbers = #tpu.dot_dimension_numbers<[1], [1], [0], [0], [0, 0, 1, 0], [], []>} : vector<16x8xf32>, vector<16x8xf32>, vector<16x16xf32> -> vector<16x16xf32>
    %137 = arith.addf %136, %1 : vector<16x16xf32>
    %cst_108 = arith.constant dense<0xFF800000> : vector<16xf32>
    %138 = vector.multi_reduction <maximumf>, %137, %cst_108 [1] : vector<16x16xf32> to vector<16xf32>
    %139 = vector.shape_cast %138 : vector<16xf32> to vector<16x1xf32>
    %140 = vector.broadcast %139 : vector<16x1xf32> to vector<16x16xf32>
    %141 = arith.subf %137, %140 : vector<16x16xf32>
    %142 = math.exp %141 : vector<16x16xf32>
    %cst_109 = arith.constant dense<0.000000e+00> : vector<16xf32>
    %143 = vector.multi_reduction <add>, %142, %cst_109 [1] : vector<16x16xf32> to vector<16xf32>
    %144 = vector.shape_cast %143 : vector<16xf32> to vector<16x1xf32>
    %145 = tpu.reciprocal %144 {approx = true} : vector<16x1xf32> -> vector<16x1xf32>
    %146 = vector.broadcast %145 : vector<16x1xf32> to vector<16x16xf32>
    %147 = arith.mulf %142, %146 : vector<16x16xf32>
    %cst_110 = arith.constant dense<0.000000e+00> : vector<16x8xf32>
    %148 = tpu.matmul %147, %135, %cst_110 {dimension_numbers = #tpu.dot_dimension_numbers<[1], [0], [0], [1], [0, 0, 1, 1], [], []>} : vector<16x16xf32>, vector<16x8xf32>, vector<16x8xf32> -> vector<16x8xf32>
    %c3_111 = arith.constant 3 : index
    %c0_112 = arith.constant 0 : index
    %c0_113 = arith.constant 0 : index
    %149 = vector.load %arg8[%c3_111, %c0_112, %c0_113] : memref<4x8x32xf32, #tpu.memory_space<vmem>>, vector<1x8x32xf32>
    %150 = vector.shape_cast %149 : vector<1x8x32xf32> to vector<8x32xf32>
    %cst_114 = arith.constant dense<0.000000e+00> : vector<16x32xf32>
    %151 = tpu.matmul %148, %150, %cst_114 {dimension_numbers = #tpu.dot_dimension_numbers<[1], [0], [0], [1], [0, 0, 1, 1], [], []>} : vector<16x8xf32>, vector<8x32xf32>, vector<16x32xf32> -> vector<16x32xf32>
    %152 = arith.addf %114, %151 : vector<16x32xf32>
    %c0_115 = arith.constant 0 : index
    %c0_116 = arith.constant 0 : index
    %153 = vector.load %arg9[%c0_115, %c0_116] : memref<1x32xf32, #tpu.memory_space<vmem>>, vector<1x32xf32>
    %154 = vector.broadcast %153 : vector<1x32xf32> to vector<16x32xf32>
    %155 = arith.addf %152, %154 : vector<16x32xf32>
    %156 = arith.addf %155, %0 : vector<16x32xf32>
    %c0_117 = arith.constant 0 : index
    %c0_118 = arith.constant 0 : index
    %157 = vector.load %arg10[%c0_117, %c0_118] : memref<1x32xf32, #tpu.memory_space<vmem>>, vector<1x32xf32>
    %c0_119 = arith.constant 0 : index
    %c0_120 = arith.constant 0 : index
    %158 = vector.load %arg11[%c0_119, %c0_120] : memref<1x32xf32, #tpu.memory_space<vmem>>, vector<1x32xf32>
    %cst_121 = arith.constant dense<0.000000e+00> : vector<16xf32>
    %159 = vector.multi_reduction <add>, %156, %cst_121 [1] : vector<16x32xf32> to vector<16xf32>
    %160 = vector.shape_cast %159 : vector<16xf32> to vector<16x1xf32>
    %cst_122 = arith.constant 3.200000e+01 : f32
    %161 = vector.broadcast %cst_122 : f32 to vector<16x1xf32>
    %162 = arith.divf %160, %161 : vector<16x1xf32>
    %163 = vector.broadcast %162 : vector<16x1xf32> to vector<16x32xf32>
    %164 = arith.subf %156, %163 : vector<16x32xf32>
    %165 = arith.mulf %164, %164 : vector<16x32xf32>
    %cst_123 = arith.constant dense<0.000000e+00> : vector<16xf32>
    %166 = vector.multi_reduction <add>, %165, %cst_123 [1] : vector<16x32xf32> to vector<16xf32>
    %167 = vector.shape_cast %166 : vector<16xf32> to vector<16x1xf32>
    %cst_124 = arith.constant 3.200000e+01 : f32
    %168 = vector.broadcast %cst_124 : f32 to vector<16x1xf32>
    %169 = arith.divf %167, %168 : vector<16x1xf32>
    %cst_125 = arith.constant 9.99999996E-13 : f32
    %170 = vector.broadcast %cst_125 : f32 to vector<16x1xf32>
    %171 = arith.addf %169, %170 : vector<16x1xf32>
    %172 = math.rsqrt %171 : vector<16x1xf32>
    %173 = vector.broadcast %172 : vector<16x1xf32> to vector<16x32xf32>
    %174 = arith.mulf %164, %173 : vector<16x32xf32>
    %175 = vector.broadcast %157 : vector<1x32xf32> to vector<16x32xf32>
    %176 = arith.mulf %175, %174 : vector<16x32xf32>
    %177 = vector.broadcast %158 : vector<1x32xf32> to vector<16x32xf32>
    %178 = arith.addf %176, %177 : vector<16x32xf32>
    %c0_126 = arith.constant 0 : index
    %c0_127 = arith.constant 0 : index
    %179 = vector.load %arg12[%c0_126, %c0_127] : memref<32x128xf32, #tpu.memory_space<vmem>>, vector<32x128xf32>
    %cst_128 = arith.constant dense<0.000000e+00> : vector<16x128xf32>
    %180 = tpu.matmul %178, %179, %cst_128 {dimension_numbers = #tpu.dot_dimension_numbers<[1], [0], [0], [1], [0, 0, 1, 1], [], []>} : vector<16x32xf32>, vector<32x128xf32>, vector<16x128xf32> -> vector<16x128xf32>
    %c0_129 = arith.constant 0 : index
    %c0_130 = arith.constant 0 : index
    %181 = vector.load %arg13[%c0_129, %c0_130] : memref<1x128xf32, #tpu.memory_space<vmem>>, vector<1x128xf32>
    %182 = vector.broadcast %181 : vector<1x128xf32> to vector<16x128xf32>
    %183 = arith.addf %180, %182 : vector<16x128xf32>
    %cst_131 = arith.constant 5.000000e-01 : f32
    %184 = vector.broadcast %cst_131 : f32 to vector<16x128xf32>
    %185 = arith.mulf %183, %184 : vector<16x128xf32>
    %cst_132 = arith.constant 1.41421354 : f32
    %186 = vector.broadcast %cst_132 : f32 to vector<16x128xf32>
    %187 = arith.divf %183, %186 : vector<16x128xf32>
    %188 = math.erf %187 : vector<16x128xf32>
    %cst_133 = arith.constant 1.000000e+00 : f32
    %189 = vector.broadcast %cst_133 : f32 to vector<16x128xf32>
    %190 = arith.addf %189, %188 : vector<16x128xf32>
    %191 = arith.mulf %185, %190 : vector<16x128xf32>
    %c0_134 = arith.constant 0 : index
    %c0_135 = arith.constant 0 : index
    %192 = vector.load %arg14[%c0_134, %c0_135] : memref<128x32xf32, #tpu.memory_space<vmem>>, vector<128x32xf32>
    %cst_136 = arith.constant dense<0.000000e+00> : vector<16x32xf32>
    %193 = tpu.matmul %191, %192, %cst_136 {dimension_numbers = #tpu.dot_dimension_numbers<[1], [0], [0], [1], [0, 0, 1, 1], [], []>} : vector<16x128xf32>, vector<128x32xf32>, vector<16x32xf32> -> vector<16x32xf32>
    %c0_137 = arith.constant 0 : index
    %c0_138 = arith.constant 0 : index
    %194 = vector.load %arg15[%c0_137, %c0_138] : memref<1x32xf32, #tpu.memory_space<vmem>>, vector<1x32xf32>
    %195 = vector.broadcast %194 : vector<1x32xf32> to vector<16x32xf32>
    %196 = arith.addf %193, %195 : vector<16x32xf32>
    %197 = arith.addf %196, %178 : vector<16x32xf32>
    %c0_139 = arith.constant 0 : index
    %c0_140 = arith.constant 0 : index
    %198 = vector.load %arg16[%c0_139, %c0_140] : memref<1x32xf32, #tpu.memory_space<vmem>>, vector<1x32xf32>
    %c0_141 = arith.constant 0 : index
    %c0_142 = arith.constant 0 : index
    %199 = vector.load %arg17[%c0_141, %c0_142] : memref<1x32xf32, #tpu.memory_space<vmem>>, vector<1x32xf32>
    %cst_143 = arith.constant dense<0.000000e+00> : vector<16xf32>
    %200 = vector.multi_reduction <add>, %197, %cst_143 [1] : vector<16x32xf32> to vector<16xf32>
    %201 = vector.shape_cast %200 : vector<16xf32> to vector<16x1xf32>
    %cst_144 = arith.constant 3.200000e+01 : f32
    %202 = vector.broadcast %cst_144 : f32 to vector<16x1xf32>
    %203 = arith.divf %201, %202 : vector<16x1xf32>
    %204 = vector.broadcast %203 : vector<16x1xf32> to vector<16x32xf32>
    %205 = arith.subf %197, %204 : vector<16x32xf32>
    %206 = arith.mulf %205, %205 : vector<16x32xf32>
    %cst_145 = arith.constant dense<0.000000e+00> : vector<16xf32>
    %207 = vector.multi_reduction <add>, %206, %cst_145 [1] : vector<16x32xf32> to vector<16xf32>
    %208 = vector.shape_cast %207 : vector<16xf32> to vector<16x1xf32>
    %cst_146 = arith.constant 3.200000e+01 : f32
    %209 = vector.broadcast %cst_146 : f32 to vector<16x1xf32>
    %210 = arith.divf %208, %209 : vector<16x1xf32>
    %cst_147 = arith.constant 9.99999996E-13 : f32
    %211 = vector.broadcast %cst_147 : f32 to vector<16x1xf32>
    %212 = arith.addf %210, %211 : vector<16x1xf32>
    %213 = math.rsqrt %212 : vector<16x1xf32>
    %214 = vector.broadcast %213 : vector<16x1xf32> to vector<16x32xf32>
    %215 = arith.mulf %205, %214 : vector<16x32xf32>
    %216 = vector.broadcast %198 : vector<1x32xf32> to vector<16x32xf32>
    %217 = arith.mulf %216, %215 : vector<16x32xf32>
    %218 = vector.broadcast %199 : vector<1x32xf32> to vector<16x32xf32>
    %219 = arith.addf %217, %218 : vector<16x32xf32>
    %c0_148 = arith.constant 0 : index
    %c0_149 = arith.constant 0 : index
    %220 = vector.load %arg18[%c0_148, %c0_149] : memref<16x32xf32, #tpu.memory_space<vmem>>, vector<16x32xf32>
    tpu.vector_store %arg18[%c0_148, %c0_149], %219 {strides = array<i32>} : memref<16x32xf32, #tpu.memory_space<vmem>>, vector<16x32xf32>,
    return
  }
}

</mosaic_0001>

<bundles_post_ra>
// kernel: layer_forward.1
= control target key start
LH: loop header
LB: loop body
LE: loop exit
PB: predicated region body
PF: predicated region fallthrough
CT: control target
= control target key end

     0   :  { %s3852_s0 = inlined_call_operand.vmem [shape: f32[16,32], index: 0, kind: input, shape index: {}]   ;;  %s3853_s1 = inlined_call_operand.vmem [shape: f32[16,16], index: 1, kind: input, shape index: {}]   ;;  %s3854_s2 = inlined_call_operand.vmem [shape: f32[4,32,8], index: 2, kind: input, shape index: {}]   ;;  %s3855_s3 = inlined_call_operand.vmem [shape: f32[4,1,8], index: 3, kind: input, shape index: {}]   ;;  %s3856_s4 = inlined_call_operand.vmem [shape: f32[4,32,8], index: 4, kind: input, shape index: {}]   ;;  %s3857_s5 = inlined_call_operand.vmem [shape: f32[4,1,8], index: 5, kind: input, shape index: {}]   ;;  %s3858_s6 = inlined_call_operand.vmem [shape: f32[4,32,8], index: 6, kind: input, shape index: {}]   ;;  %s3859_s7 = inlined_call_operand.vmem [shape: f32[4,1,8], index: 7, kind: input, shape index: {}]   ;;  %s3860_s8 = inlined_call_operand.vmem [shape: f32[4,8,32], index: 8, kind: input, shape index: {}]   ;;  %s3861_s9 = inlined_call_operand.vmem [shape: f32[1,32], index: 9, kind: input, shape index: {}]   ;;  %s3862_s10 = inlined_call_operand.vmem [shape: f32[1,32], index: 10, kind: input, shape index: {}]   ;;  %s3863_s11 = inlined_call_operand.vmem [shape: f32[1,32], index: 11, kind: input, shape index: {}]   ;;  %s3864_s12 = inlined_call_operand.vmem [shape: f32[32,128], index: 12, kind: input, shape index: {}]   ;;  %s3865_s13 = inlined_call_operand.vmem [shape: f32[1,128], index: 13, kind: input, shape index: {}]   ;;  %s3866_s14 = inlined_call_operand.vmem [shape: f32[128,32], index: 14, kind: input, shape index: {}]   ;;  %s3867_s15 = inlined_call_operand.vmem [shape: f32[1,32], index: 15, kind: input, shape index: {}]   ;;  %s3868_s16 = inlined_call_operand.vmem [shape: f32[1,32], index: 16, kind: input, shape index: {}]   ;;  %s3869_s17 = inlined_call_operand.vmem [shape: f32[1,32], index: 17, kind: input, shape index: {}]   ;;  %s3870_s18 = inlined_call_operand.hbm [shape: f32[16,32], index: 18, kind: output, shape index: {}]  }
   0x1   :  { %3874 = sst [smem:[#allocation5_spill]] %s3852_s0 }
   0x2   :  { %3875 = sst [smem:[#allocation6_spill]] %s3853_s1 }
   0x3   :  { %3876 = sst [smem:[#allocation7_spill]] %s3854_s2 }
   0x4   :  { %s3877_s29 = sld [smem:[#allocation7_spill]]  ;;  %vm75_vm0 = vcmask 261120   ;;  %s3878_s23 = sld [smem:[#allocation5_spill]]  ;;  %v157_v7 = vld [vmem:[%s3856_s4] sm:$0xff]  ;;  %v158_v8 = vld [vmem:[%s3856_s4 + $0x8] sm:$0xff] }
   0xa   :  { %v64_v0 = vld [vmem:[%s3877_s29] sm:$0xff]  ;;  %v65_v1 = vld [vmem:[%s3877_s29 + $0x8] sm:$0xff]  ;;  %v66_v2 = vld [vmem:[%s3877_s29 + $0x10] sm:$0xff] }
   0xb   :  { %v3058_v3 = vpack.c.bf16 %v65_v1, %v64_v0  ;;  %v67_v4 = vld [vmem:[%s3877_s29 + $0x18] sm:$0xff]  ;;  %v3424_v5 = vld [vmem:[%s3878_s23] sm:$0xff] }
   0xc   :  { %v3062_v6 = vpack.c.bf16 %v67_v4, %v66_v2  ;;  %2812 = vmatprep.mubr.msk.f32.mxu1 %vm75_vm0, %v3424_v5 }
   0xd   :  { %3059 = vmatprep.subr.bf16.mxu1 %v3058_v3 }
   0xe   :  { %3061 = vmatpush3.bf16.msra.mxu1 %v3058_v3 }
   0xf   :  { %23 = vsyncpa [#allocation3], 0  ;;  %3063 = vmatprep.subr.bf16.mxu1 %v3062_v6  ;;  %v3066_v9 = vpack.c.bf16 %v158_v8, %v157_v7  ;;  %v159_v10 = vld [vmem:[%s3856_s4 + $0x10] sm:$0xff]  ;;  %v160_v11 = vld [vmem:[%s3856_s4 + $0x18] sm:$0xff]  ;;  %vm329_vm1 = vcmask 64512   ;;  %s3881_s2 = sld [smem:[#allocation6_spill]] }
  0x10   :  { %v3443_v12 = vld [vmem:[%s3878_s23 + $0x8] sm:$0xff]  ;;  %v3070_v13 = vpack.c.bf16 %v160_v11, %v159_v10  ;;  %v243_v14 = vld [vmem:[%s3858_s6] sm:$0xff]  ;;  %v245_v17 = vld [vmem:[%s3858_s6 + $0x10] sm:$0xff]  ;;  %vm417_vm3 = vcmask 130048   ;;  %s3311_s21 = smov [#allocation2]  }
  0x11   :  { %v244_v15 = vld [vmem:[%s3858_s6 + $0x8] sm:$0xff]  ;;  %v246_v18 = vld [vmem:[%s3858_s6 + $0x18] sm:$0xff]  ;;  %v2539_v20 = vld [vmem:[%s3855_s3] ss:$0 sm:$0xff]  ;;  %s2528_s22 = sshll.u32 %s3311_s21, 4  ;;  %s2529_s22 = int_to_ptr.vmem [resolvable:$true] %s2528_s22 }
  0x12   :  { %3065 = vmatpush3.bf16.msra.mxu1 %v3062_v6  ;;  %v3074_v16 = vpack.c.bf16 %v244_v15, %v243_v14  ;;  %v3078_v19 = vpack.c.bf16 %v246_v18, %v245_v17  ;;  %v2542_v24 = vld [vmem:[%s3857_s5] ss:$0 sm:$0xff]  ;;  %vm3476_vm2 = vmpackc.low %vm329_vm1, %vm329_vm1  ;;  %v2563_v57 = vld [vmem:[%s3856_s4 + $0x28] sm:$0xff]  ;;  %p3292_p1 = scmp.lt.s32.totalorder %s2529_s22, %s2529_s22 }
  0x13   :  { %3067 = vmatprep.subr.bf16.mxu1 %v3066_v9  ;;  %v2545_v31 = vld [vmem:[%s3859_s7] ss:$0 sm:$0xff]  ;;  %v2555_v60 = vld [vmem:[%s3877_s29 + $0x28] sm:$0xff]  ;;  %v2556_v62 = vld [vmem:[%s3877_s29 + $0x30] sm:$0xff] }
  0x14   :  { %v2562_v56 = vld [vmem:[%s3856_s4 + $0x20] sm:$0xff]  ;;  %v2557_v63 = vld [vmem:[%s3877_s29 + $0x38] sm:$0xff]  ;;  %v2564_v6 = vld [vmem:[%s3856_s4 + $0x30] sm:$0xff] }
  0x15   :  { %2813 = vmatmul.mubr.msk.f32.vlgmr.msra.gmra.mrb[0].mxu1 %vm75_vm0, %v3443_v12  ;;  %v3493_v38 = vld [vmem:[%s3881_s2] sm:$0xff]  ;;  %v3498_v40 = vld [vmem:[%s3881_s2 + $0x8] sm:$0xff]  ;;  %v3100_v58 = vpack.c.bf16 %v2563_v57, %v2562_v56  ;;  %v3096_v0 = vpack.c.bf16 %v2557_v63, %v2556_v62  ;;  %v2565_v7 = vld [vmem:[%s3856_s4 + $0x38] sm:$0xff] }
  0x16   :  { %3069 = vmatpush3.bf16.msra.mxu1 %v3066_v9  ;;  %2823 = vmatprep.mubr.msk.f32.mxu1 %vm75_vm0, %v3424_v5  ;;  %v2554_v59 = vld [vmem:[%s3877_s29 + $0x20] sm:$0xff]  ;;  %v3104_v10 = vpack.c.bf16 %v2565_v7, %v2564_v6  ;;  %v2584_v56 = vld [vmem:[%s3860_s8 + $0x8] sm:$0xff]  ;;  %v2641_v29 = vld [vmem:[%s3858_s6 + $0x78] sm:$0xff] }
  0x17   :  { %3071 = vmatprep.subr.bf16.mxu1 %v3070_v13  ;;  %v3092_v61 = vpack.c.bf16 %v2555_v60, %v2554_v59  ;;  %v2559_v11 = vld [vmem:[%s3855_s3 + $0x1] ss:$0 sm:$0xff] }
  0x18   :  { %v521_v63 = vld [vmem:[%s3860_s8] sm:$0xff] }
  0x19   :  { %v2597_v7 = vld [vmem:[%s3856_s4 + $0x40] sm:$0xff] }
  0x1a   :  { %3073 = vmatpush3.bf16.msra.mxu1 %v3070_v13 }
  0x1b   :  { %3075 = vmatprep.subr.bf16.mxu1 %v3074_v16 }
  0x1d   :  { %2824 = vmatmul.mubr.msk.f32.vlgmr.msra.gmra.mrb[2].mxu1 %vm75_vm0, %v3443_v12 }
  0x1e   :  { %3077 = vmatpush3.bf16.msra.mxu1 %v3074_v16  ;;  %2834 = vmatprep.mubr.msk.f32.mxu1 %vm75_vm0, %v3424_v5 }
  0x1f   :  { %3079 = vmatprep.subr.bf16.mxu1 %v3078_v19 }
  0x22   :  { %3081 = vmatpush3.bf16.msra.mxu1 %v3078_v19  ;;  %v2567_v19 = vld [vmem:[%s3857_s5 + $0x1] ss:$0 sm:$0xff] }
  0x25   :  { %2835 = vmatmul.mubr.msk.f32.vlgmr.msra.gmra.mrb[4].mxu1 %vm75_vm0, %v3443_v12 }
  0xe8   :  { %v2814_v21 = vpop.f32.mrb[0].mxu1 }
  0xe9   :  { %v148_v22 = vpop.f32.mrb[1].mxu1  ;;  %v154_v36 = vadd.f32 %v2814_v21, %v2539_v20 }
  0xea   :  { %v149_v23 = vadd.f32 %v2539_v20, %v148_v22 }
  0xec   :  { %2841 = vmatprep.mubr.msk.f32.mxu1 %vm329_vm1, %v149_v23 }
  0xf0   :  { %v2825_v25 = vpop.f32.mrb[2].mxu1 }
  0xf1   :  { %v240_v26 = vadd.f32 %v2825_v25, %v2542_v24  ;;  %v234_v27 = vpop.f32.mrb[3].mxu1  ;;  %v2570_v25 = vld [vmem:[%s3858_s6 + $0x20] sm:$0xff] }
  0xf2   :  { %v235_v28 = vadd.f32 %v2542_v24, %v234_v27  ;;  %v2572_v27 = vld [vmem:[%s3858_s6 + $0x30] sm:$0xff] }
  0xf4   :  { %v3082_v30 = vpack.c.bf16 %v240_v26, %v235_v28  ;;  %v2571_v26 = vld [vmem:[%s3858_s6 + $0x28] sm:$0xff] }
  0xf5   :  { %v3108_v28 = vpack.c.bf16 %v2571_v26, %v2570_v25 }
  0xf6   :  { %3084 = vmatprep.subr.msk.bf16.mxu1 %vm3476_vm2, %v3082_v30 }
  0xf7   :  { %3087 = vmatpush3.bf16.xpose.msk.msra.mxu1 %vm3476_vm2, %v3082_v30  ;;  %v2573_v30 = vld [vmem:[%s3858_s6 + $0x38] sm:$0xff] }
  0xf8   :  { %v2836_v32 = vpop.f32.mrb[4].mxu1  ;;  %3093 = vmatprep.subr.bf16.mxu1 %v3092_v61 }
  0xf9   :  { %v326_v33 = vadd.f32 %v2836_v32, %v2545_v31  ;;  %v320_v34 = vpop.f32.mrb[5].mxu1 }
  0xfa   :  { %v321_v35 = vadd.f32 %v2545_v31, %v320_v34  ;;  %v3112_v31 = vpack.c.bf16 %v2573_v30, %v2572_v27  ;;  %v2605_v27 = vld [vmem:[%s3858_s6 + $0x40] sm:$0xff]  ;;  %v2607_v30 = vld [vmem:[%s3858_s6 + $0x50] sm:$0xff] }
  0xfc   :  { %v3088_v37 = vpack.c.bf16 %v326_v33, %v321_v35 }
  0xfe   :  { %2842 = vmatmul.mubr.msk.f32.vlgmr.msra.gmra.mrb[6].mxu1 %vm329_vm1, %v154_v36  ;;  %3089 = vmatprep.subr.bf16.mxu0 %v3088_v37 }
  0xff   :  { %3091 = vmatpush3.bf16.msra.mxu0 %v3088_v37  ;;  %2859 = vmatprep.mubr.msk.f32.mxu1 %vm75_vm0, %v3424_v5 }
 0x100   :  { %3101 = vmatprep.subr.bf16.mxu0 %v3100_v58  ;;  %3095 = vmatpush3.bf16.msra.mxu1 %v3092_v61 }
 0x101   :  { %3097 = vmatprep.subr.bf16.mxu1 %v3096_v0 }
 0x104   :  { %3099 = vmatpush3.bf16.msra.mxu1 %v3096_v0  ;;  %v2589_v0 = vld [vmem:[%s3877_s29 + $0x40] sm:$0xff] }
 0x105   :  { %3109 = vmatprep.subr.bf16.mxu1 %v3108_v28 }
 0x107   :  { %2860 = vmatmul.mubr.msk.f32.vlgmr.msra.gmra.mrb[8].mxu1 %vm75_vm0, %v3443_v12 }
 0x108   :  { %2881 = vmatprep.mubr.msk.f32.mxu1 %vm75_vm0, %v3424_v5  ;;  %3111 = vmatpush3.bf16.msra.mxu1 %v3108_v28  ;;  %v2606_v28 = vld [vmem:[%s3858_s6 + $0x48] sm:$0xff] }
 0x109   :  { %3113 = vmatprep.subr.bf16.mxu1 %v3112_v31 }
 0x10c   :  { %3115 = vmatpush3.bf16.msra.mxu1 %v3112_v31  ;;  %v3142_v31 = vpack.c.bf16 %v2606_v28, %v2605_v27  ;;  %v2638_v28 = vld [vmem:[%s3858_s6 + $0x60] sm:$0xff] }
 0x10f   :  { %2882 = vmatmul.mubr.msk.f32.vlgmr.msra.gmra.mrb[10].mxu1 %vm75_vm0, %v3443_v12 }
 0x1d1   :  { %v2843_v39 = vpop.f32.mrb[6].mxu1 }
 0x1d2   :  { %v408_v41 = vpop.f32.mrb[7].mxu1  ;;  %v414_v43 = vadd.f32 %v2843_v39, %v3498_v40 }
 0x1d3   :  { %v409_v42 = vadd.f32 %v408_v41, %v3493_v38 }
 0x1d4   :  { %v421_v45 = vsel %vm417_vm3, %v414_v43, -inf }
 0x1d5   :  { %v418_v44 = vsel %vm417_vm3, %v409_v42, -inf }
 0x1d6   :  { %419 = vmax.xlane.f32.xlu0 %v418_v44 }
 0x1da   :  { %422 = vmax.xlane.f32.xlu0 %v421_v45  ;;  %v2861_v13 = vpop.f32.mrb[8].mxu1 }
 0x1db   :  { %v607_v14 = vadd.f32 %v2861_v13, %v2559_v11  ;;  %v601_v15 = vpop.f32.mrb[9].mxu1  ;;  %v2599_v13 = vld [vmem:[%s3856_s4 + $0x50] sm:$0xff] }
 0x1dc   :  { %v602_v16 = vadd.f32 %v2559_v11, %v601_v15 }
 0x263   :  { %v420_v46 = vpop.xlane.xlu0 %419 }
 0x264   :  { %v424_v47 = vsub.f32 %v409_v42, %v420_v46 }
 0x266   :  { %v426_v48 = vmul.f32 1.442695, %v424_v47 }
 0x267   :  { %v423_v49 = vpop.xlane.xlu0 %422 }
 0x268   :  { %3243 = vpow2.f32 %v426_v48  ;;  %v425_v50 = vsub.f32 %v414_v43, %v423_v49 }
 0x26a   :  { %v428_v51 = vmul.f32 1.442695, %v425_v50  ;;  %v2883_v50 = vpop.f32.mrb[10].mxu1 }
 0x26c   :  { %3245 = vpow2.f32 %v428_v51  ;;  %v2575_v51 = vld [vmem:[%s3859_s7 + $0x1] ss:$0 sm:$0xff] }
 0x272   :  { %v3244_v52 = vpop.eup %3243 }
 0x273   :  { %v430_v53 = vsel %vm417_vm3, %v3244_v52, 0.0 }
 0x274   :  { %431 = vadd.xlane.f32.xlu1 %v430_v53  ;;  %v783_v53 = vadd.f32 %v2883_v50, %v2575_v51 }
 0x276   :  { %v3246_v54 = vpop.eup %3245 }
 0x277   :  { %v433_v55 = vsel %vm417_vm3, %v3246_v54, 0.0 }
 0x278   :  { %434 = vadd.xlane.f32.xlu1 %v433_v55 }
 0x301   :  { %v432_v1 = vpop.xlane.xlu1 %431 }
 0x302   :  { %3247 = vrcp.f32 %v432_v1  ;;  %v2590_v1 = vld [vmem:[%s3877_s29 + $0x48] sm:$0xff] }
 0x305   :  { %v435_v2 = vpop.xlane.xlu1 %434 }
 0x306   :  { %3249 = vrcp.f32 %v435_v2  ;;  %v3126_v2 = vpack.c.bf16 %v2590_v1, %v2589_v0  ;;  %v2630_v1 = vld [vmem:[%s3856_s4 + $0x60] sm:$0xff] }
 0x30c   :  { %v3248_v3 = vpop.eup %3247 }
 0x30d   :  { %v438_v4 = vmul.f32 %v3248_v3, %v3244_v52  ;;  %v777_v52 = vpop.f32.mrb[11].mxu1  ;;  %v2591_v3 = vld [vmem:[%s3877_s29 + $0x50] sm:$0xff] }
 0x30f   :  { %2848 = vmatprep.mubr.msk.f32.mxu0 %vm417_vm3, %v438_v4  ;;  %v2592_v4 = vld [vmem:[%s3877_s29 + $0x58] sm:$0xff] }
 0x310   :  { %v3250_v8 = vpop.eup %3249  ;;  %v3130_v6 = vpack.c.bf16 %v2592_v4, %v2591_v3  ;;  %v2622_v4 = vld [vmem:[%s3877_s29 + $0x60] sm:$0xff] }
 0x311   :  { %v439_v9 = vmul.f32 %v3250_v8, %v3246_v54  ;;  %v778_v54 = vadd.f32 %v2575_v51, %v777_v52  ;;  %v2598_v8 = vld [vmem:[%s3856_s4 + $0x48] sm:$0xff] }
 0x312   :  { %v3134_v11 = vpack.c.bf16 %v2598_v8, %v2597_v7  ;;  %v2624_v8 = vld [vmem:[%s3877_s29 + $0x70] sm:$0xff] }
 0x313   :  { %2849 = vmatmul.mubr.msk.f32.vlgmr.msra.gmra.mrb[0].mxu0 %vm417_vm3, %v439_v9  ;;  %v3122_v55 = vpack.c.bf16 %v783_v53, %v778_v54  ;;  %v2610_v53 = vld [vmem:[%s3859_s7 + $0x2] ss:$0 sm:$0xff] }
 0x314   :  { %3103 = vmatpush3.bf16.msra.mxu0 %v3100_v58  ;;  %2870 = vmatprep.mubr.msk.f32.mxu0 %vm75_vm0, %v3424_v5 }
 0x315   :  { %3105 = vmatprep.subr.bf16.mxu0 %v3104_v10  ;;  %3123 = vmatprep.subr.bf16.mxu1 %v3122_v55 }
 0x316   :  { %3125 = vmatpush3.bf16.msra.mxu1 %v3122_v55 }
 0x317   :  { %3127 = vmatprep.subr.bf16.mxu1 %v3126_v2 }
 0x318   :  { %3107 = vmatpush3.bf16.msra.mxu0 %v3104_v10 }
 0x31b   :  { %2871 = vmatmul.mubr.msk.f32.vlgmr.msra.gmra.mrb[2].mxu0 %vm75_vm0, %v3443_v12 }
 0x31c   :  { %2888 = vmatprep.mubr.msk.f32.mxu0 %vm329_vm1, %v602_v16  ;;  %v2594_v16 = vld [vmem:[%s3855_s3 + $0x2] ss:$0 sm:$0xff] }
 0x3e6   :  { %v3544_v17 = vpop.f32.mrb[0].mxu0 }
 0x3e7   :  { %v3546_v18 = vpop.f32.mrb[1].mxu0 }
 0x3ee   :  { %v2872_v20 = vpop.f32.mrb[2].mxu0 }
 0x3ef   :  { %v695_v21 = vadd.f32 %v2872_v20, %v2567_v19  ;;  %v689_v22 = vpop.f32.mrb[3].mxu0 }
 0x3f0   :  { %v690_v23 = vadd.f32 %v2567_v19, %v689_v22 }
 0x3f2   :  { %v3116_v24 = vpack.c.bf16 %v695_v21, %v690_v23 }
 0x3f4   :  { %3118 = vmatprep.subr.msk.bf16.mxu0 %vm3476_vm2, %v3116_v24 }
 0x3f5   :  { %3121 = vmatpush3.bf16.xpose.msk.msra.mxu0 %vm3476_vm2, %v3116_v24 }
 0x3f6   :  { %2898 = vmatprep.subr.mxu0 %v2584_v56 }
 0x3fc   :  { %2889 = vmatmul.mubr.msk.f32.vlgmr.msra.gmra.mrb[4].mxu0 %vm329_vm1, %v607_v14  ;;  %v2600_v14 = vld [vmem:[%s3856_s4 + $0x58] sm:$0xff] }
 0x3fd   :  { %2899 = vmatpush3.msra.mxu0 %v2584_v56  ;;  %v3138_v15 = vpack.c.bf16 %v2600_v14, %v2599_v13  ;;  %v2633_v13 = vld [vmem:[%s3856_s4 + $0x78] sm:$0xff] }
 0x3fe   :  { %2903 = vmatprep.subr.mxu0 %v521_v63 }
 0x4cf   :  { %v2890_v32 = vpop.f32.mrb[4].mxu0 }
 0x4d0   :  { %v870_v33 = vadd.f32 %v2890_v32, %v3498_v40  ;;  %v864_v34 = vpop.f32.mrb[5].mxu0  ;;  %v2608_v32 = vld [vmem:[%s3858_s6 + $0x58] sm:$0xff] }
 0x4d1   :  { %v865_v35 = vadd.f32 %v864_v34, %v3493_v38 }
 0x4d2   :  { %v876_v36 = vsel %vm417_vm3, %v870_v33, -inf }
 0x4d3   :  { %877 = vmax.xlane.f32.xlu1 %v876_v36  ;;  %v873_v37 = vsel %vm417_vm3, %v865_v35, -inf }
 0x4d4   :  { %874 = vmax.xlane.f32.xlu0 %v873_v37 }
 0x560   :  { %v878_v39 = vpop.xlane.xlu1 %877 }
 0x561   :  { %v880_v41 = vsub.f32 %v870_v33, %v878_v39  ;;  %v875_v42 = vpop.xlane.xlu0 %874  ;;  %v3146_v33 = vpack.c.bf16 %v2608_v32, %v2607_v30  ;;  %v2639_v30 = vld [vmem:[%s3858_s6 + $0x68] sm:$0xff] }
 0x562   :  { %v879_v43 = vsub.f32 %v865_v35, %v875_v42  ;;  %v3176_v32 = vpack.c.bf16 %v2639_v30, %v2638_v28  ;;  %v2379_v28 = vld [vmem:[%s3866_s14 + $0x10] sm:$0xff] }
 0x563   :  { %v883_v44 = vmul.f32 1.442695, %v880_v41 }
 0x564   :  { %v881_v45 = vmul.f32 1.442695, %v879_v43 }
 0x565   :  { %3251 = vpow2.f32 %v883_v44 }
 0x566   :  { %3253 = vpow2.f32 %v881_v45 }
 0x56f   :  { %v3252_v46 = vpop.eup %3251 }
 0x570   :  { %v3254_v47 = vpop.eup %3253  ;;  %v888_v48 = vsel %vm417_vm3, %v3252_v46, 0.0 }
 0x571   :  { %889 = vadd.xlane.f32.xlu1 %v888_v48  ;;  %v885_v49 = vsel %vm417_vm3, %v3254_v47, 0.0 }
 0x572   :  { %886 = vadd.xlane.f32.xlu0 %v885_v49 }
 0x5fe   :  { %v890_v57 = vpop.xlane.xlu1 %889 }
 0x5ff   :  { %3255 = vrcp.f32 %v890_v57  ;;  %v887_v58 = vpop.xlane.xlu0 %886 }
 0x600   :  { %3257 = vrcp.f32 %v887_v58  ;;  %v2619_v58 = vld [vmem:[%s3860_s8 + $0x10] sm:$0xff] }
 0x609   :  { %v3256_v59 = vpop.eup %3255 }
 0x60a   :  { %v3258_v60 = vpop.eup %3257  ;;  %v894_v62 = vmul.f32 %v3256_v59, %v3252_v46 }
 0x60b   :  { %v893_v61 = vmul.f32 %v3258_v60, %v3254_v47 }
 0x60d   :  { %2895 = vmatprep.mubr.msk.f32.mxu1 %vm417_vm3, %v893_v61 }
 0x60e   :  { %2896 = vmatmul.mubr.msk.f32.vlgmr.msra.gmra.mrb[12].mxu1 %vm417_vm3, %v894_v62 }
 0x60f   :  { %2916 = vmatprep.mubr.msk.f32.mxu1 %vm75_vm0, %v3424_v5  ;;  %3129 = vmatpush3.bf16.msra.mxu1 %v3126_v2  ;;  %v2631_v2 = vld [vmem:[%s3856_s4 + $0x68] sm:$0xff] }
 0x610   :  { %3131 = vmatprep.subr.bf16.mxu1 %v3130_v6  ;;  %v3168_v3 = vpack.c.bf16 %v2631_v2, %v2630_v1  ;;  %v2655_v1 = vld [vmem:[%s3861_s9] ss:$0 sm:$0xff] }
 0x613   :  { %3133 = vmatpush3.bf16.msra.mxu1 %v3130_v6  ;;  %v2623_v6 = vld [vmem:[%s3877_s29 + $0x68] sm:$0xff] }
 0x614   :  { %3143 = vmatprep.subr.bf16.mxu1 %v3142_v31  ;;  %v3160_v7 = vpack.c.bf16 %v2623_v6, %v2622_v4 }
 0x616   :  { %2917 = vmatmul.mubr.msk.f32.vlgmr.msra.gmra.mrb[14].mxu1 %vm75_vm0, %v3443_v12 }
 0x617   :  { %2938 = vmatprep.mubr.msk.f32.mxu1 %vm75_vm0, %v3424_v5  ;;  %3145 = vmatpush3.bf16.msra.mxu1 %v3142_v31  ;;  %v2640_v31 = vld [vmem:[%s3858_s6 + $0x70] sm:$0xff] }
 0x618   :  { %3147 = vmatprep.subr.bf16.mxu1 %v3146_v33 }
 0x61b   :  { %3149 = vmatpush3.bf16.msra.mxu1 %v3146_v33  ;;  %v3180_v33 = vpack.c.bf16 %v2641_v29, %v2640_v31  ;;  %v2380_v31 = vld [vmem:[%s3866_s14 + $0x18] sm:$0xff]  ;;  %v2381_v29 = vld [vmem:[%s3866_s14 + $0x20] sm:$0xff] }
 0x61e   :  { %2939 = vmatmul.mubr.msk.f32.vlgmr.msra.gmra.mrb[16].mxu1 %vm75_vm0, %v3443_v12 }
 0x6e1   :  { %v2897_v9 = vpop.f32.mrb[12].mxu1 }
 0x6e2   :  { %v967_v10 = vpop.f32.mrb[13].mxu1 }
 0x6e3   :  { %2900 = vmatprep.mubr.msk.f32.mxu0 %vm329_vm1, %v967_v10 }
 0x6e4   :  { %2901 = vmatmul.mubr.msk.f32.vlgmr.msra.gmra.mrb[6].mxu0 %vm329_vm1, %v2897_v9  ;;  %v2625_v9 = vld [vmem:[%s3877_s29 + $0x78] sm:$0xff] }
 0x6e5   :  { %2904 = vmatpush3.msra.mxu0 %v521_v63  ;;  %2905 = vmatprep.mubr.msk.f32.mxu0 %vm329_vm1, %v3546_v18  ;;  %v3164_v10 = vpack.c.bf16 %v2625_v9, %v2624_v8 }
 0x6e6   :  { %3135 = vmatprep.subr.bf16.mxu0 %v3134_v11 }
 0x6e9   :  { %v2918_v18 = vpop.f32.mrb[14].mxu1 }
 0x6ea   :  { %v1225_v19 = vadd.f32 %v2918_v18, %v2594_v16  ;;  %v1219_v20 = vpop.f32.mrb[15].mxu1  ;;  %v2627_v18 = vld [vmem:[%s3855_s3 + $0x3] ss:$0 sm:$0xff] }
 0x6eb   :  { %v1220_v21 = vadd.f32 %v2594_v16, %v1219_v20 }
 0x6ec   :  { %2906 = vmatmul.mubr.msk.f32.vlgmr.msra.gmra.mrb[6].mxu0 %vm329_vm1, %v3544_v17  ;;  %v2602_v17 = vld [vmem:[%s3857_s5 + $0x2] ss:$0 sm:$0xff] }
 0x6ed   :  { %3137 = vmatpush3.bf16.msra.mxu0 %v3134_v11  ;;  %2927 = vmatprep.mubr.msk.f32.mxu0 %vm75_vm0, %v3424_v5  ;;  %v2632_v11 = vld [vmem:[%s3856_s4 + $0x70] sm:$0xff] }
 0x6ee   :  { %3139 = vmatprep.subr.bf16.mxu0 %v3138_v15  ;;  %v3172_v16 = vpack.c.bf16 %v2633_v13, %v2632_v11 }
 0x6f1   :  { %3141 = vmatpush3.bf16.msra.mxu0 %v3138_v15  ;;  %v2940_v52 = vpop.f32.mrb[16].mxu1 }
 0x6f2   :  { %v1395_v54 = vpop.f32.mrb[17].mxu1  ;;  %v1401_v55 = vadd.f32 %v2940_v52, %v2610_v53 }
 0x6f3   :  { %v1396_v56 = vadd.f32 %v2610_v53, %v1395_v54 }
 0x6f4   :  { %2928 = vmatmul.mubr.msk.f32.vlgmr.msra.gmra.mrb[8].mxu0 %vm75_vm0, %v3443_v12 }
 0x6f5   :  { %2945 = vmatprep.mubr.msk.f32.mxu0 %vm329_vm1, %v1220_v21  ;;  %v3156_v57 = vpack.c.bf16 %v1401_v55, %v1396_v56  ;;  %v2652_v56 = vld [vmem:[%s3860_s8 + $0x18] sm:$0xff] }
 0x6f7   :  { %3157 = vmatprep.subr.bf16.mxu1 %v3156_v57 }
 0x6f8   :  { %3159 = vmatpush3.bf16.msra.mxu1 %v3156_v57 }
 0x6f9   :  { %3161 = vmatprep.subr.bf16.mxu1 %v3160_v7 }
 0x7c7   :  { %v2929_v22 = vpop.f32.mrb[8].mxu0 }
 0x7c8   :  { %v1313_v23 = vadd.f32 %v2929_v22, %v2602_v17  ;;  %v1307_v24 = vpop.f32.mrb[9].mxu0  ;;  %v2635_v22 = vld [vmem:[%s3857_s5 + $0x3] ss:$0 sm:$0xff] }
 0x7c9   :  { %v1308_v25 = vadd.f32 %v2602_v17, %v1307_v24 }
 0x7cb   :  { %v3150_v26 = vpack.c.bf16 %v1313_v23, %v1308_v25 }
 0x7cd   :  { %3152 = vmatprep.subr.msk.bf16.mxu0 %vm3476_vm2, %v3150_v26 }
 0x7ce   :  { %3155 = vmatpush3.bf16.xpose.msk.msra.mxu0 %vm3476_vm2, %v3150_v26 }
 0x7cf   :  { %2955 = vmatprep.subr.mxu0 %v2619_v58 }
 0x7d5   :  { %2946 = vmatmul.mubr.msk.f32.vlgmr.msra.gmra.mrb[10].mxu0 %vm329_vm1, %v1225_v19 }
 0x7d6   :  { %2956 = vmatpush3.msra.mxu0 %v2619_v58 }
 0x7d7   :  { %3169 = vmatprep.subr.bf16.mxu0 %v3168_v3 }
 0x8a8   :  { %v2947_v34 = vpop.f32.mrb[10].mxu0 }
 0x8a9   :  { %v1488_v35 = vadd.f32 %v2947_v34, %v3498_v40  ;;  %v1482_v36 = vpop.f32.mrb[11].mxu0 }
 0x8aa   :  { %v1483_v37 = vadd.f32 %v1482_v36, %v3493_v38 }
 0x8ab   :  { %v1494_v39 = vsel %vm417_vm3, %v1488_v35, -inf }
 0x8ac   :  { %1495 = vmax.xlane.f32.xlu1 %v1494_v39  ;;  %v1491_v41 = vsel %vm417_vm3, %v1483_v37, -inf }
 0x8ad   :  { %1492 = vmax.xlane.f32.xlu0 %v1491_v41 }
 0x939   :  { %v1496_v42 = vpop.xlane.xlu1 %1495 }
 0x93a   :  { %v1498_v43 = vsub.f32 %v1488_v35, %v1496_v42  ;;  %v1493_v44 = vpop.xlane.xlu0 %1492 }
 0x93b   :  { %v1497_v45 = vsub.f32 %v1483_v37, %v1493_v44 }
 0x93c   :  { %v1501_v46 = vmul.f32 1.442695, %v1498_v43 }
 0x93d   :  { %v1499_v47 = vmul.f32 1.442695, %v1497_v45 }
 0x93e   :  { %3259 = vpow2.f32 %v1501_v46 }
 0x93f   :  { %3261 = vpow2.f32 %v1499_v47 }
 0x948   :  { %v3260_v48 = vpop.eup %3259 }
 0x949   :  { %v3262_v49 = vpop.eup %3261  ;;  %v1506_v50 = vsel %vm417_vm3, %v3260_v48, 0.0 }
 0x94a   :  { %1507 = vadd.xlane.f32.xlu1 %v1506_v50  ;;  %v1503_v51 = vsel %vm417_vm3, %v3262_v49, 0.0 }
 0x94b   :  { %1504 = vadd.xlane.f32.xlu0 %v1503_v51  ;;  %v2643_v51 = vld [vmem:[%s3859_s7 + $0x3] ss:$0 sm:$0xff] }
 0x9d7   :  { %v1508_v59 = vpop.xlane.xlu1 %1507 }
 0x9d8   :  { %3263 = vrcp.f32 %v1508_v59  ;;  %v1505_v60 = vpop.xlane.xlu0 %1504 }
 0x9d9   :  { %3265 = vrcp.f32 %v1505_v60 }
 0x9e2   :  { %v3264_v61 = vpop.eup %3263 }
 0x9e3   :  { %v3266_v62 = vpop.eup %3265  ;;  %v1512_v0 = vmul.f32 %v3264_v61, %v3260_v48 }
 0x9e4   :  { %v1511_v63 = vmul.f32 %v3266_v62, %v3262_v49 }
 0x9e6   :  { %2952 = vmatprep.mubr.msk.f32.mxu1 %vm417_vm3, %v1511_v63 }
 0x9e7   :  { %2953 = vmatmul.mubr.msk.f32.vlgmr.msra.gmra.mrb[18].mxu1 %vm417_vm3, %v1512_v0 }
 0x9e8   :  { %2968 = vmatprep.mubr.msk.f32.mxu1 %vm75_vm0, %v3424_v5  ;;  %3163 = vmatpush3.bf16.msra.mxu1 %v3160_v7 }
 0x9e9   :  { %3165 = vmatprep.subr.bf16.mxu1 %v3164_v10 }
 0x9ec   :  { %3167 = vmatpush3.bf16.msra.mxu1 %v3164_v10 }
 0x9ed   :  { %3177 = vmatprep.subr.bf16.mxu1 %v3176_v32 }
 0x9ef   :  { %2969 = vmatmul.mubr.msk.f32.vlgmr.msra.gmra.mrb[20].mxu1 %vm75_vm0, %v3443_v12 }
 0x9f0   :  { %2990 = vmatprep.mubr.msk.f32.mxu1 %vm75_vm0, %v3424_v5  ;;  %3179 = vmatpush3.bf16.msra.mxu1 %v3176_v32  ;;  %v3206_v32 = vpack.c.bf16 %v2380_v31, %v2379_v28 }
 0x9f1   :  { %3181 = vmatprep.subr.bf16.mxu1 %v3180_v33 }
 0x9f4   :  { %3183 = vmatpush3.bf16.msra.mxu1 %v3180_v33  ;;  %v2382_v33 = vld [vmem:[%s3866_s14 + $0x28] sm:$0xff] }
 0x9f7   :  { %2991 = vmatmul.mubr.msk.f32.vlgmr.msra.gmra.mrb[22].mxu1 %vm75_vm0, %v3443_v12 }
 0xaba   :  { %v2954_v14 = vpop.f32.mrb[18].mxu1 }
 0xabb   :  { %v1585_v15 = vpop.f32.mrb[19].mxu1 }
 0xabc   :  { %2957 = vmatprep.mubr.msk.f32.mxu0 %vm329_vm1, %v1585_v15 }
 0xabd   :  { %2958 = vmatmul.mubr.msk.f32.vlgmr.msra.gmra.mrb[6].mxu0 %vm329_vm1, %v2954_v14 }
 0xabe   :  { %3171 = vmatpush3.bf16.msra.mxu0 %v3168_v3  ;;  %2979 = vmatprep.mubr.msk.f32.mxu0 %vm75_vm0, %v3424_v5 }
 0xabf   :  { %3173 = vmatprep.subr.bf16.mxu0 %v3172_v16 }
 0xac2   :  { %3175 = vmatpush3.bf16.msra.mxu0 %v3172_v16  ;;  %v2970_v19 = vpop.f32.mrb[20].mxu1 }
 0xac3   :  { %v1764_v20 = vadd.f32 %v2970_v19, %v2627_v18  ;;  %v1758_v21 = vpop.f32.mrb[21].mxu1 }
 0xac4   :  { %v1759_v17 = vadd.f32 %v2627_v18, %v1758_v21 }
 0xac5   :  { %2980 = vmatmul.mubr.msk.f32.vlgmr.msra.gmra.mrb[12].mxu0 %vm75_vm0, %v3443_v12 }
 0xac6   :  { %2997 = vmatprep.mubr.msk.f32.mxu0 %vm329_vm1, %v1759_v17  ;;  %v2275_v17 = vld [vmem:[%s3864_s12 + $0x8] sm:$0xff] }
 0xaca   :  { %v2992_v50 = vpop.f32.mrb[22].mxu1 }
 0xacb   :  { %v1934_v52 = vpop.f32.mrb[23].mxu1  ;;  %v1940_v53 = vadd.f32 %v2992_v50, %v2643_v51 }
 0xacc   :  { %v1935_v54 = vadd.f32 %v2643_v51, %v1934_v52  ;;  %v2383_v51 = vld [vmem:[%s3866_s14 + $0x30] sm:$0xff]  ;;  %v2384_v52 = vld [vmem:[%s3866_s14 + $0x38] sm:$0xff] }
 0xace   :  { %v3190_v55 = vpack.c.bf16 %v1940_v53, %v1935_v54  ;;  %v3214_v53 = vpack.c.bf16 %v2384_v52, %v2383_v51  ;;  %v2385_v54 = vld [vmem:[%s3866_s14 + $0x40] sm:$0xff] }
 0xad0   :  { %3191 = vmatprep.subr.bf16.mxu1 %v3190_v55 }
 0xad1   :  { %3193 = vmatpush3.bf16.msra.mxu1 %v3190_v55  ;;  %v2386_v55 = vld [vmem:[%s3866_s14 + $0x48] sm:$0xff] }
 0xb98   :  { %v2981_v23 = vpop.f32.mrb[12].mxu0 }
 0xb99   :  { %v1852_v24 = vadd.f32 %v2981_v23, %v2635_v22  ;;  %v1846_v25 = vpop.f32.mrb[13].mxu0  ;;  %v2276_v23 = vld [vmem:[%s3864_s12 + $0x10] sm:$0xff] }
 0xb9a   :  { %v1847_v26 = vadd.f32 %v2635_v22, %v1846_v25 }
 0xb9c   :  { %v3184_v27 = vpack.c.bf16 %v1852_v24, %v1847_v26  ;;  %v2277_v24 = vld [vmem:[%s3864_s12 + $0x18] sm:$0xff]  ;;  %v2377_v26 = vld [vmem:[%s3866_s14] sm:$0xff] }
 0xb9d   :  { %v3198_v25 = vpack.c.bf16 %v2277_v24, %v2276_v23 }
 0xb9e   :  { %3186 = vmatprep.subr.msk.bf16.mxu0 %vm3476_vm2, %v3184_v27 }
 0xb9f   :  { %3189 = vmatpush3.bf16.xpose.msk.msra.mxu0 %vm3476_vm2, %v3184_v27  ;;  %v2378_v27 = vld [vmem:[%s3866_s14 + $0x8] sm:$0xff] }
 0xba0   :  { %3007 = vmatprep.subr.mxu0 %v2652_v56  ;;  %v3202_v30 = vpack.c.bf16 %v2378_v27, %v2377_v26 }
 0xba6   :  { %2998 = vmatmul.mubr.msk.f32.vlgmr.msra.gmra.mrb[14].mxu0 %vm329_vm1, %v1764_v20 }
 0xba7   :  { %3008 = vmatpush3.msra.mxu0 %v2652_v56  ;;  %v3218_v56 = vpack.c.bf16 %v2386_v55, %v2385_v54 }
 0xba8   :  { %3203 = vmatprep.subr.bf16.mxu0 %v3202_v30 }
 0xc79   :  { %v2999_v34 = vpop.f32.mrb[14].mxu0 }
 0xc7a   :  { %v2027_v35 = vadd.f32 %v2999_v34, %v3498_v40  ;;  %v2021_v36 = vpop.f32.mrb[15].mxu0  ;;  %v3210_v34 = vpack.c.bf16 %v2382_v33, %v2381_v29 }
 0xc7b   :  { %v2022_v37 = vadd.f32 %v2021_v36, %v3493_v38 }
 0xc7c   :  { %v2033_v39 = vsel %vm417_vm3, %v2027_v35, -inf }
 0xc7d   :  { %2034 = vmax.xlane.f32.xlu1 %v2033_v39  ;;  %v2030_v41 = vsel %vm417_vm3, %v2022_v37, -inf }
 0xc7e   :  { %2031 = vmax.xlane.f32.xlu0 %v2030_v41 }
 0xd0a   :  { %v2035_v42 = vpop.xlane.xlu1 %2034 }
 0xd0b   :  { %v2037_v43 = vsub.f32 %v2027_v35, %v2035_v42  ;;  %v2032_v44 = vpop.xlane.xlu0 %2031 }
 0xd0c   :  { %v2036_v45 = vsub.f32 %v2022_v37, %v2032_v44  ;;  %v2656_v44 = vld [vmem:[%s3862_s10] ss:$0 sm:$0xff]  ;;  %s3287_s10 = scalar_lea.vmem %s2529_s22, 256 }
 0xd0d   :  { %v2040_v46 = vmul.f32 1.442695, %v2037_v43  ;;  %p3288_p0 = scmp.ne.s32.totalorder %s2529_s22, %s3287_s10  ;;  %p3293_p2 = scmp.lt.s32.totalorder %s3287_s10, %s3287_s10 }
 0xd0e   :  { %v2038_v47 = vmul.f32 1.442695, %v2036_v45 }
 0xd0f   :  { %3267 = vpow2.f32 %v2040_v46  ;;  %p3294_p3 = por %p3293_p2, %p3292_p1 }
 0xd10   :  { %3269 = vpow2.f32 %v2038_v47 }
 0xd11   :  { %p3295_p4 = pnand %p3294_p3, %p3288_p0 }
 0xd19   :  { %v3268_v48 = vpop.eup %3267 }
 0xd1a   :  { %v3270_v49 = vpop.eup %3269  ;;  %v2045_v40 = vsel %vm417_vm3, %v3268_v48, 0.0 }
 0xd1b   :  { %2046 = vadd.xlane.f32.xlu1 %v2045_v40  ;;  %v2042_v38 = vsel %vm417_vm3, %v3270_v49, 0.0 }
 0xd1c   :  { %2043 = vadd.xlane.f32.xlu0 %v2042_v38 }
 0xda8   :  { %v2047_v57 = vpop.xlane.xlu1 %2046 }
 0xda9   :  { %3271 = vrcp.f32 %v2047_v57  ;;  %v2044_v58 = vpop.xlane.xlu0 %2043  ;;  %v2387_v57 = vld [vmem:[%s3866_s14 + $0x50] sm:$0xff] }
 0xdaa   :  { %3273 = vrcp.f32 %v2044_v58  ;;  %v2388_v58 = vld [vmem:[%s3866_s14 + $0x58] sm:$0xff] }
 0xdb3   :  { %v3272_v59 = vpop.eup %3271 }
 0xdb4   :  { %v3274_v60 = vpop.eup %3273  ;;  %v2051_v62 = vmul.f32 %v3272_v59, %v3268_v48  ;;  %v2657_v48 = vld [vmem:[%s3863_s11] ss:$0 sm:$0xff]  ;;  %v3222_v59 = vpack.c.bf16 %v2388_v58, %v2387_v57 }
 0xdb5   :  { %v2050_v61 = vmul.f32 %v3274_v60, %v3270_v49  ;;  %v2389_v60 = vld [vmem:[%s3866_s14 + $0x60] sm:$0xff] }
 0xdb7   :  { %3004 = vmatprep.mubr.msk.f32.mxu1 %vm417_vm3, %v2050_v61  ;;  %v2390_v61 = vld [vmem:[%s3866_s14 + $0x68] sm:$0xff] }
 0xdb8   :  { %3005 = vmatmul.mubr.msk.f32.vlgmr.msra.gmra.mrb[24].mxu1 %vm417_vm3, %v2051_v62  ;;  %v3226_v62 = vpack.c.bf16 %v2390_v61, %v2389_v60 }
 0xe8b   :  { %v3006_v63 = vpop.f32.mrb[24].mxu1 }
 0xe8c   :  { %v2124_v0 = vpop.f32.mrb[25].mxu1 }
 0xe8d   :  { %3009 = vmatprep.mubr.msk.f32.mxu0 %vm329_vm1, %v2124_v0  ;;  %v2392_v0 = vld [vmem:[%s3866_s14 + $0x78] sm:$0xff] }
 0xe8e   :  { %3010 = vmatmul.mubr.msk.f32.vlgmr.msra.gmra.mrb[6].mxu0 %vm329_vm1, %v3006_v63  ;;  %v2391_v63 = vld [vmem:[%s3866_s14 + $0x70] sm:$0xff] }
 0xe8f   :  { %3205 = vmatpush3.bf16.msra.mxu0 %v3202_v30 }
 0xe90   :  { %3207 = vmatprep.subr.bf16.mxu0 %v3206_v32 }
 0xe93   :  { %3209 = vmatpush3.bf16.msra.mxu0 %v3206_v32 }
 0xe94   :  { %3211 = vmatprep.subr.bf16.mxu0 %v3210_v34 }
 0xe97   :  { %3213 = vmatpush3.bf16.msra.mxu0 %v3210_v34 }
 0xe98   :  { %3215 = vmatprep.subr.bf16.mxu0 %v3214_v53 }
 0xe9b   :  { %3217 = vmatpush3.bf16.msra.mxu0 %v3214_v53 }
 0xe9c   :  { %3219 = vmatprep.subr.bf16.mxu0 %v3218_v56 }
 0xe9f   :  { %3221 = vmatpush3.bf16.msra.mxu0 %v3218_v56 }
 0xea0   :  { %3223 = vmatprep.subr.bf16.mxu0 %v3222_v59 }
 0xea3   :  { %3225 = vmatpush3.bf16.msra.mxu0 %v3222_v59 }
 0xea4   :  { %3227 = vmatprep.subr.bf16.mxu0 %v3226_v62 }
 0xea7   :  { %3229 = vmatpush3.bf16.msra.mxu0 %v3226_v62 }
 0xf61   :  { %v3011_v2 = vpop.f32.mrb[6].mxu0 }
 0xf62   :  { %v2226_v3 = vadd.f32 %v3011_v2, %v2655_v1  ;;  %v2207_v4 = vpop.f32.mrb[7].mxu0  ;;  %v2658_v2 = vld [vmem:[%s3865_s13] ss:$0 sm:$0xff] }
 0xf63   :  { %v2225_v6 = vadd.f32 %v2655_v1, %v2207_v4  ;;  %v3230_v1 = vpack.c.bf16 %v2392_v0, %v2391_v63 }
 0xf64   :  { %v2228_v7 = vadd.f32 %v2226_v3, %v3443_v12 }
 0xf65   :  { %v2227_v8 = vadd.f32 %v2225_v6, %v3424_v5  ;;  %v2274_v5 = vld [vmem:[%s3864_s12] sm:$0xff]  ;;  %3231 = vmatprep.subr.bf16.mxu0 %v3230_v1 }
 0xf66   :  { %v2234_v9 = vsel %vm75_vm0, %v2228_v7, 0.0  ;;  %v3194_v22 = vpack.c.bf16 %v2275_v17, %v2274_v5  ;;  %3233 = vmatpush3.bf16.msra.mxu0 %v3230_v1 }
 0xf67   :  { %2235 = vadd.xlane.f32.xlu1 %v2234_v9  ;;  %v2231_v10 = vsel %vm75_vm0, %v2227_v8, 0.0 }
 0xf68   :  { %2232 = vadd.xlane.f32.xlu0 %v2231_v10  ;;  %3195 = vmatprep.subr.bf16.mxu1 %v3194_v22 }
 0xf69   :  { %3197 = vmatpush3.bf16.msra.mxu1 %v3194_v22 }
 0xf6a   :  { %3199 = vmatprep.subr.bf16.mxu1 %v3198_v25 }
 0xf6d   :  { %3201 = vmatpush3.bf16.msra.mxu1 %v3198_v25 }
 0xff4   :  { %v2236_v11 = vpop.xlane.xlu1 %2235 }
 0xff5   :  { %v2239_v13 = vmul.f32 0.03125, %v2236_v11  ;;  %v2233_v14 = vpop.xlane.xlu0 %2232 }
 0xff6   :  { %v2238_v15 = vmul.f32 0.03125, %v2233_v14 }
 0xff7   :  { %v2241_v16 = vsub.f32 %v2228_v7, %v2239_v13 }
 0xff8   :  { %v2240_v18 = vsub.f32 %v2227_v8, %v2238_v15 }
 0xff9   :  { %v2243_v19 = vmul.f32 %v2241_v16, %v2241_v16 }
 0xffa   :  { %v2242_v20 = vmul.f32 %v2240_v18, %v2240_v18 }
 0xffb   :  { %v2247_v21 = vsel %vm75_vm0, %v2243_v19, 0.0 }
 0xffc   :  { %2248 = vadd.xlane.f32.xlu1 %v2247_v21  ;;  %v2244_v12 = vsel %vm75_vm0, %v2242_v20, 0.0  ;;  %v2661_v20 = vld [vmem:[%s3867_s15] ss:$0 sm:$0xff] }
 0xffd   :  { %2245 = vadd.xlane.f32.xlu0 %v2244_v12 }
0x1089   :  { %v2249_v35 = vpop.xlane.xlu1 %2248 }
0x108a   :  { %v2251_v36 = vmul.f32 0.03125, %v2249_v35  ;;  %v2246_v37 = vpop.xlane.xlu0 %2245 }
0x108b   :  { %v2250_v39 = vmul.f32 0.03125, %v2246_v37 }
0x108c   :  { %v2253_v41 = vadd.f32 1e-12, %v2251_v36 }
0x108d   :  { %v2252_v42 = vadd.f32 1e-12, %v2250_v39 }
0x108e   :  { %3275 = vrsqrt.f32 %v2253_v41 }
0x108f   :  { %3277 = vrsqrt.f32 %v2252_v42 }
0x1098   :  { %v3276_v43 = vpop.eup %3275 }
0x1099   :  { %v3278_v45 = vpop.eup %3277  ;;  %v2257_v46 = vmul.f32 %v3276_v43, %v2241_v16 }
0x109a   :  { %v2256_v47 = vmul.f32 %v3278_v45, %v2240_v18  ;;  %v2662_v45 = vld [vmem:[%s3868_s16] ss:$0 sm:$0xff] }
0x109b   :  { %v2265_v49 = vmul.f32 %v2656_v44, %v2257_v46 }
0x109c   :  { %v2264_v40 = vmul.f32 %v2656_v44, %v2256_v47 }
0x109d   :  { %v2273_v50 = vadd.f32 %v2657_v48, %v2265_v49  ;;  %v2663_v49 = vld [vmem:[%s3869_s17] ss:$0 sm:$0xff] }
0x109e   :  { %v2272_v38 = vadd.f32 %v2657_v48, %v2264_v40 }
0x10a0   :  { %3020 = vmatprep.mubr.msk.f32.mxu1 %vm75_vm0, %v2272_v38 }
0x10a1   :  { %3021 = vmatmul.mubr.msk.f32.vlgmr.msra.gmra.mrb[26].mxu1 %vm75_vm0, %v2273_v50 }
0x1174   :  { %v3022_v3 = vpop.f32.mrb[26].mxu1 }
0x1175   :  { %v2363_v4 = vadd.f32 %v3022_v3, %v2658_v2  ;;  %v2357_v6 = vpop.f32.mrb[27].mxu1 }
0x1176   :  { %v2358_v7 = vadd.f32 %v2658_v2, %v2357_v6 }
0x1177   :  { %v2370_v8 = vmul.f32 0.70710677, %v2363_v4  ;;  %v2367_v16 = vmul.f32 0.5, %v2363_v4 }
0x1178   :  { %v2369_v9 = vmul.f32 0.70710677, %v2358_v7  ;;  %v2366_v14 = vmul.f32 0.5, %v2358_v7 }
0x1179   :  { %3279 = verf.f32 %v2370_v8 }
0x117a   :  { %3281 = verf.f32 %v2369_v9 }
0x1183   :  { %v3280_v10 = vpop.eup %3279 }
0x1184   :  { %v3282_v11 = vpop.eup %3281  ;;  %v2374_v13 = vadd.f32 1.0, %v3280_v10 }
0x1185   :  { %v2373_v15 = vadd.f32 1.0, %v3282_v11 }
0x1186   :  { %v2376_v19 = vmul.f32 %v2374_v13, %v2367_v16 }
0x1187   :  { %v2375_v18 = vmul.f32 %v2373_v15, %v2366_v14 }
0x1189   :  { %3055 = vmatprep.mubr.f32.mxu0 %v2375_v18 }
0x118a   :  { %3056 = vmatmul.mubr.f32.vlgmr.msra.gmra.mrb[16].mxu0 %v2376_v19 }
0x125d   :  { %v3057_v21 = vpop.f32.mrb[16].mxu0 }
0x125e   :  { %v2472_v12 = vadd.f32 %v3057_v21, %v2661_v20  ;;  %v2466_v5 = vpop.f32.mrb[17].mxu0 }
0x125f   :  { %v2467_v17 = vadd.f32 %v2661_v20, %v2466_v5 }
0x1260   :  { %v2476_v22 = vadd.f32 %v2472_v12, %v2273_v50 }
0x1261   :  { %v2475_v23 = vadd.f32 %v2467_v17, %v2272_v38 }
0x1262   :  { %v2482_v24 = vsel %vm75_vm0, %v2476_v22, 0.0 }
0x1263   :  { %2483 = vadd.xlane.f32.xlu1 %v2482_v24  ;;  %v2479_v25 = vsel %vm75_vm0, %v2475_v23, 0.0 }
0x1264   :  { %2480 = vadd.xlane.f32.xlu0 %v2479_v25 }
0x12f0   :  { %v2484_v26 = vpop.xlane.xlu1 %2483 }
0x12f1   :  { %v2486_v27 = vmul.f32 0.03125, %v2484_v26  ;;  %v2481_v28 = vpop.xlane.xlu0 %2480 }
0x12f2   :  { %v2485_v30 = vmul.f32 0.03125, %v2481_v28 }
0x12f3   :  { %v2488_v31 = vsub.f32 %v2476_v22, %v2486_v27 }
0x12f4   :  { %v2487_v32 = vsub.f32 %v2475_v23, %v2485_v30 }
0x12f5   :  { %v2490_v29 = vmul.f32 %v2488_v31, %v2488_v31 }
0x12f6   :  { %v2489_v33 = vmul.f32 %v2487_v32, %v2487_v32 }
0x12f7   :  { %v2494_v34 = vsel %vm75_vm0, %v2490_v29, 0.0 }
0x12f8   :  { %2495 = vadd.xlane.f32.xlu1 %v2494_v34  ;;  %v2491_v35 = vsel %vm75_vm0, %v2489_v33, 0.0 }
0x12f9   :  { %2492 = vadd.xlane.f32.xlu0 %v2491_v35 }
0x1385   :  { %v2496_v36 = vpop.xlane.xlu1 %2495 }
0x1386   :  { %v2498_v37 = vmul.f32 0.03125, %v2496_v36  ;;  %v2493_v39 = vpop.xlane.xlu0 %2492 }
0x1387   :  { %v2497_v41 = vmul.f32 0.03125, %v2493_v39 }
0x1388   :  { %v2500_v42 = vadd.f32 1e-12, %v2498_v37 }
0x1389   :  { %v2499_v43 = vadd.f32 1e-12, %v2497_v41 }
0x138a   :  { %3283 = vrsqrt.f32 %v2500_v42 }
0x138b   :  { %3285 = vrsqrt.f32 %v2499_v43 }
0x1394   :  { %v3284_v44 = vpop.eup %3283 }
0x1395   :  { %v3286_v46 = vpop.eup %3285  ;;  %v2504_v47 = vmul.f32 %v3284_v44, %v2488_v31 }
0x1396   :  { %v2503_v48 = vmul.f32 %v3286_v46, %v2487_v32 }
0x1397   :  { %v2512_v40 = vmul.f32 %v2662_v45, %v2504_v47 }
0x1398   :  { %v2511_v38 = vmul.f32 %v2662_v45, %v2503_v48 }
0x1399   :  { %v2520_v50 = vadd.f32 %v2663_v49, %v2512_v40 }
0x139a   :  { %v2519_v51 = vadd.f32 %v2663_v49, %v2511_v38 }
0x139b   :  { %2522 = vst.msk [vmem:[#allocation2 + $0x8] sm:$0xff] %vm75_vm0, %v2520_v50 }
0x139c   :  { %2521 = vst.msk [vmem:[#allocation2] sm:$0xff] %vm75_vm0, %v2519_v51 }
0x139d   :  { %3298 = shalt.err (!%p3295_p4)
}
0x139e   :  { %s3299_s2 = scalar_lea.hbm %s3870_s18, 256 }
0x139f   :  { %p3300_p5 = scmp.ne.s32.totalorder %s3870_s18, %s3299_s2  ;;  %p3303_p6 = scmp.lt.u32.totalorder %s3299_s2, %s3870_s18 }
0x13a1   :  { %p3305_p7 = pnand %p3303_p6, %p3300_p5 }
0x13a3   :  { %3308 = shalt.err (!%p3305_p7)
}
0x13a4   :  { %s3312_s23 = smov 128   ;;  %s3313_s3 = smov 8  }
0x13a5   :  { %2534 = dma.vmem_to_hbm [thread:$0]  %s2529_s22, 256, %s3870_s18, [#allocation3], %s3312_s23, %s3312_s23, %s3313_s3  }
0x13a6   :  { %3309 = dma.done.wait [#allocation3], 256  }
0x13a7   :  { %3310 = vsyncadd [#allocation3], 4294967040 }
0x13a8   :  { %2538 = vsyncpa [#allocation3], 1 }

</bundles_post_ra>
